<compile_context>
chip_gen: v7x
topology: tpu7x:2x2x1
jax: 0.10.0
libtpu: 0.0.40
codegen_flags: <defaults>
</compile_context>

<pallas_src>
import functools

import jax
import jax.numpy as jnp
from jax import lax
from jax.experimental import pallas as pl
from jax.experimental.pallas import tpu as pltpu


def _round_up(x, m):
    return (x + m - 1) // m * m


def _pick_tile(n, maximum=512):
    """Largest multiple-of-128 tile <= maximum that divides n."""
    for t in (512, 384, 256, 128):
        if t <= maximum and n % t == 0:
            return t
    raise ValueError(f"dimension {n} is not a multiple of 128")


# ----------------------------------------------------------------------------
# Pallas kernels
# ----------------------------------------------------------------------------
def gemm_bias_kernel(p_ref, w_ref, b_ref, o_ref, acc_ref, *, tk):
    """Tiled bf16 GEMM + f32 accumulate + bias.

    grid=(Mt, Nt, Kt) with K last; the weight block is the full-K (K, tn) slab
    (resident in VMEM across i and k), sliced per K step with pl.ds.
    """
    k = pl.program_id(2)

    @pl.when(k == 0)
    def _():
        acc_ref[...] = jnp.zeros_like(acc_ref)

    k0 = pl.multiple_of(k * tk, tk)
    acc_ref[...] += jnp.dot(p_ref[...], w_ref[pl.ds(k0, tk), :],
                            preferred_element_type=jnp.float32)

    @pl.when(k == pl.num_programs(2) - 1)
    def _():
        o_ref[...] = (acc_ref[...] + b_ref[...]).astype(o_ref.dtype)


def gemm_stats_kernel(p_ref, w_ref, o_ref, sum_ref, sq_ref, acc_ref, *, tk):
    """Tiled bf16 GEMM (no bias -- absorbed by BatchNorm) + per-(M tile, channel)
    partial sums of y and y*y for BatchNorm statistics (from the f32 acc).

    NOTE: zero-padded M rows contribute exactly 0 to both sums ONLY because the
    conv bias is dropped here; do not re-add a bias to this kernel.
    """
    k = pl.program_id(2)

    @pl.when(k == 0)
    def _():
        acc_ref[...] = jnp.zeros_like(acc_ref)

    k0 = pl.multiple_of(k * tk, tk)
    acc_ref[...] += jnp.dot(p_ref[...], w_ref[pl.ds(k0, tk), :],
                            preferred_element_type=jnp.float32)

    @pl.when(k == pl.num_programs(2) - 1)
    def _():
        y = acc_ref[...]
        o_ref[...] = y.astype(o_ref.dtype)            # bf16 writeback
        sum_ref[...] = jnp.sum(y, axis=0, keepdims=True)[None]
        sq_ref[...] = jnp.sum(y * y, axis=0, keepdims=True)[None]


def bn_lrelu_kernel(y_ref, scale_ref, shift_ref, o_ref, *, neg_slope):
    """Elementwise y*scale + shift followed by LeakyReLU; bf16 in, bf16 out,
    math in f32 (scale/shift are f32)."""
    y = y_ref[...].astype(jnp.float32) * scale_ref[...] + shift_ref[...]
    o_ref[...] = jnp.where(y >= 0.0, y, neg_slope * y).astype(o_ref.dtype)


# ----------------------------------------------------------------------------
# pallas_call wrappers
# ----------------------------------------------------------------------------
def conv_gemm(p_pad, w_res, b_pad, *, tm, tk, tn, compute_stats, out_dtype):
    Mp, K = p_pad.shape
    Kw, Np = w_res.shape
    assert Kw == K, (Kw, K)
    gm, gn, gk = Mp // tm, Np // tn, K // tk

    p_spec = pl.BlockSpec((tm, tk), lambda i, j, k: (i, k))
    # Weight resident across M tiles and K steps: DMA'd once per j (gn is 1 for
    # the wide layers), not gm*gk times.
    w_spec = pl.BlockSpec((K, tn), lambda i, j, k: (0, j))
    o_spec = pl.BlockSpec((tm, tn), lambda i, j, k: (i, j))
    scratch = [pltpu.VMEM((tm, tn), jnp.float32)]
    cparams = pltpu.CompilerParams(
        dimension_semantics=("parallel", "parallel", "arbitrary"),
        vmem_limit_bytes=32 * 1024 * 1024)
    out_bytes = jnp.dtype(out_dtype).itemsize
    cost = pl.CostEstimate(
        flops=2 * Mp * K * Np,
        transcendentals=0,
        bytes_accessed=int(Mp * K * 2 * gn      # patch tiles (bf16), per j pass
                           + K * Np * 2         # resident weight read once
                           + Mp * Np * out_bytes),
    )

    if compute_stats:
        stat_spec = pl.BlockSpec((1, 1, tn), lambda i, j, k: (i, 0, j))
        y, ssum, ssq = pl.pallas_call(
            functools.partial(gemm_stats_kernel, tk=tk),
            out_shape=(jax.ShapeDtypeStruct((Mp, Np), out_dtype),
                       jax.ShapeDtypeStruct((gm, 1, Np), jnp.float32),
                       jax.ShapeDtypeStruct((gm, 1, Np), jnp.float32)),
            grid=(gm, gn, gk),
            in_specs=[p_spec, w_spec],
            out_specs=(o_spec, stat_spec, stat_spec),
            scratch_shapes=scratch,
            compiler_params=cparams,
            cost_estimate=cost,
        )(p_pad, w_res)
        return y, ssum, ssq

    y = pl.pallas_call(
        functools.partial(gemm_bias_kernel, tk=tk),
        out_shape=jax.ShapeDtypeStruct((Mp, Np), out_dtype),
        grid=(gm, gn, gk),
        in_specs=[p_spec, w_spec, pl.BlockSpec((1, tn), lambda i, j, k: (0, j))],
        out_specs=o_spec,
        scratch_shapes=scratch,
        compiler_params=cparams,
        cost_estimate=cost,
    )(p_pad, w_res, b_pad)
    return y, None, None


def bn_lrelu_apply(y, scale, shift, *, tm, tn, neg_slope, out_dtype):
    Mp, Np = y.shape
    gm, gn = Mp // tm, Np // tn
    return pl.pallas_call(
        functools.partial(bn_lrelu_kernel, neg_slope=neg_slope),
        out_shape=jax.ShapeDtypeStruct((Mp, Np), out_dtype),
        grid=(gm, gn),
        in_specs=[pl.BlockSpec((tm, tn), lambda i, j: (i, j)),
                  pl.BlockSpec((1, tn), lambda i, j: (0, j)),
                  pl.BlockSpec((1, tn), lambda i, j: (0, j))],
        out_specs=pl.BlockSpec((tm, tn), lambda i, j: (i, j)),
        compiler_params=pltpu.CompilerParams(
            dimension_semantics=("parallel", "parallel")),
    )(y, scale, shift)


# ----------------------------------------------------------------------------
# JAX glue: im2col (channels-last, channel-padded) + per-layer driver
# ----------------------------------------------------------------------------
def _im2col_nhwc(x, kh, kw, stride, pad):
    # TODO(synk): still materialized in HBM; generating patch tiles inside the
    # GEMM kernel would remove the kh*kw expansion from HBM traffic.
    N, H, W, C = x.shape
    xp = jnp.pad(x, ((0, 0), (pad, pad), (pad, pad), (0, 0)))
    Ho = (H + 2 * pad - kh) // stride + 1
    Wo = (W + 2 * pad - kw) // stride + 1
    cols = []
    for i in range(kh):
        for j in range(kw):
            cols.append(xp[:, i:i + stride * (Ho - 1) + 1:stride,
                           j:j + stride * (Wo - 1) + 1:stride, :])
    patches = jnp.stack(cols, axis=3)                      # [N, Ho, Wo, kh*kw, C]
    patches = patches.reshape(N * Ho * Wo, kh * kw * C)    # K order = (i, j, c)
    return patches, Ho, Wo


def conv_layer(x, layer, *, out_dtype):
    # x: [N, H, W, Cpad_in] bf16, channel-padded (padded channels are zeros).
    N, H, W, cp_in = x.shape
    assert cp_in == layer["cin_pad"], (cp_in, layer["cin_pad"])
    kh = kw = layer["ksize"]
    patches, Ho, Wo = _im2col_nhwc(x, kh, kw, layer["stride"], layer["padding"])
    M, K = patches.shape
    assert K == layer["K"], (K, layer["K"])
    Np, tk, tn = layer["Np"], layer["tk"], layer["tn"]

    tm = min(1024, _round_up(M, 16))      # multiple of 16 (bf16 packed sublanes)
    Mp = _round_up(M, tm)
    if Mp > M:
        # Zero rows so padded M rows contribute exactly 0 to the BN sums
        # (valid only because the conv bias is dropped in the stats path).
        patches = jnp.pad(patches, ((0, Mp - M), (0, 0)))

    if layer["use_bn"]:
        # Pass 1: GEMM (bf16 out) + per-tile sum / sum-of-squares (f32).
        y, psum, psq = conv_gemm(patches, layer["w_pad"], None,
                                 tm=tm, tk=tk, tn=tn,
                                 compute_stats=True, out_dtype=jnp.bfloat16)
        # Tiny per-channel reduction in JAX: per-tile shifted (Chan) combine to
        # avoid the E[y^2]-E[y]^2 cancellation over the full M range.
        gm = Mp // tm
        counts = jnp.array([float(tm)] * (gm - 1) + [float(M - (gm - 1) * tm)],
                           dtype=jnp.float32)
        s = psum[:, 0, :]                               # (gm, Np)
        q = psq[:, 0, :]
        tile_mean = s / counts[:, None]
        tile_m2 = jnp.maximum(q - s * tile_mean, 0.0)
        mean = jnp.sum(s, axis=0) / M
        var = (jnp.sum(tile_m2, axis=0)
               + jnp.sum(counts[:, None] * jnp.square(tile_mean - mean), axis=0)) / M
        var = jnp.maximum(var, 0.0)
        scale = layer["gamma_pad"] * lax.rsqrt(var + 1e-5)
        shift = layer["beta_pad"] - mean * scale
        # Pass 2: cheap elementwise normalize + LeakyReLU (bf16 in / bf16 out).
        y = bn_lrelu_apply(y, scale[None, :], shift[None, :],
                           tm=tm, tn=tn, neg_slope=layer["neg_slope"],
                           out_dtype=out_dtype)
    else:
        # TODO(synk): final Cout=1 layer still pads N to 128 for the MXU; a
        # lane-wise VPU reduction would avoid the 127/128 waste (layer is tiny).
        y, _, _ = conv_gemm(patches, layer["w_pad"], layer["b_pad"],
                            tm=tm, tk=tk, tn=tn,
                            compute_stats=False, out_dtype=out_dtype)

    # Keep the padded channels (they stay exactly zero) between layers: stores
    # remain lane-dense and the next layer's weights carry zero rows for them.
    return y[:M].reshape(N, Ho, Wo, Np)


# ----------------------------------------------------------------------------
# Parameter construction (deterministic, synthetic). Weight repack/pad/bf16-cast
# is done once here, not per forward call.
# ----------------------------------------------------------------------------
def init_patch_discriminator(key, in_channels=1, num_layers=8, num_filters=64,
                             kernel_size=4, padding=1):
    specs = [(in_channels, num_filters, 2, False, None)]
    nf_mult = 1
    for n in range(1, num_layers):
        nf_mult_prev, nf_mult = nf_mult, min(2 ** n, 8)
        specs.append((num_filters * nf_mult_prev, num_filters * nf_mult, 2, True, 0.2))
    nf_mult_prev, nf_mult = nf_mult, min(2 ** num_layers, 8)
    specs.append((num_filters * nf_mult_prev, num_filters * nf_mult, 1, True, 0.2))
    specs.append((num_filters * nf_mult, 1, 1, False, None))

    layers = []
    keys = jax.random.split(key, len(specs))
    prev_np = None
    for li, (lk, (cin, cout, stride, use_bn, neg)) in enumerate(zip(keys, specs)):
        wk, bk, gk_, bek = jax.random.split(lk, 4)
        w = 0.02 * jax.random.normal(wk, (cout, cin, kernel_size, kernel_size),
                                     dtype=jnp.float32)
        b = 0.01 * jax.random.normal(bk, (cout,), dtype=jnp.float32)
        gamma = 1.0 + 0.1 * jax.random.normal(gk_, (cout,), dtype=jnp.float32)
        beta = 0.1 * jax.random.normal(bek, (cout,), dtype=jnp.float32)

        # Channel-padded input: the previous layer's padded output channels (or
        # the padded network input for layer 0).  kh*kw = 16, so cin_pad being a
        # multiple of 8 makes K a multiple of 128 -> no K padding of patches.
        cin_pad = _round_up(cin, 8) if li == 0 else prev_np
        assert cin_pad >= cin
        K = kernel_size * kernel_size * cin_pad
        tk = _pick_tile(K)
        Np = _round_up(cout, 128)
        tn = _pick_tile(Np)
        prev_np = Np

        # OIHW -> HWIO, zero-pad Cin->cin_pad and Cout->Np, reshape to [K, Np]
        # in the im2col (i, j, c) K order, bf16 cast -- all hoisted to init.
        w_hwio = jnp.transpose(w, (2, 3, 1, 0))                    # (kh,kw,cin,cout)
        w_hwio = jnp.pad(w_hwio, ((0, 0), (0, 0),
                                  (0, cin_pad - cin), (0, Np - cout)))
        w_pad = w_hwio.reshape(K, Np).astype(jnp.bfloat16)
        b_pad = jnp.pad(b, (0, Np - cout)).reshape(1, Np)
        gamma_pad = jnp.pad(gamma, (0, Np - cout))
        beta_pad = jnp.pad(beta, (0, Np - cout))

        layers.append(dict(
            w=w, b=b, gamma=gamma, beta=beta,               # raw (for reference)
            w_pad=w_pad, b_pad=b_pad,
            gamma_pad=gamma_pad, beta_pad=beta_pad,
            cin=cin, cin_pad=cin_pad, cout=cout, K=K, Np=Np, tk=tk, tn=tn,
            ksize=kernel_size, stride=stride, padding=padding,
            use_bn=use_bn, neg_slope=neg,
        ))
    return layers


def patch_discriminator_forward(layers, x_nchw):
    # NCHW -> NHWC once at the boundary; activations stay channels-last, bf16,
    # channel-padded to the layer's padded width between layers.
    x = jnp.transpose(x_nchw, (0, 2, 3, 1)).astype(jnp.bfloat16)
    cp0 = layers[0]["cin_pad"]
    if cp0 > x.shape[-1]:
        x = jnp.pad(x, ((0, 0), (0, 0), (0, 0), (0, cp0 - x.shape[-1])))
    n_layers = len(layers)
    for idx, layer in enumerate(layers):
        last = idx == n_layers - 1
        x = conv_layer(x, layer,
                       out_dtype=jnp.float32 if last else jnp.bfloat16)
    x = x[..., :layers[-1]["cout"]]                     # drop channel padding
    return jnp.transpose(x.astype(jnp.float32), (0, 3, 1, 2))   # NCHW out


# ----------------------------------------------------------------------------
# Pure-JAX reference (same bf16 rounding points, f32 math) for validation.
# ----------------------------------------------------------------------------
def reference_forward(layers, x_nchw):
    x = jnp.transpose(x_nchw, (0, 2, 3, 1)).astype(jnp.bfloat16)
    n_layers = len(layers)
    for idx, layer in enumerate(layers):
        last = idx == n_layers - 1
        w = jnp.transpose(layer["w"], (2, 3, 1, 0))
        w = w.astype(jnp.bfloat16).astype(jnp.float32)
        y = lax.conv_general_dilated(
            x.astype(jnp.float32), w,
            window_strides=(layer["stride"],) * 2,
            padding=[(layer["padding"], layer["padding"])] * 2,
            dimension_numbers=("NHWC", "HWIO", "NHWC"),
            precision=lax.Precision.HIGHEST)
        if layer["use_bn"]:
            # bias is mathematically absorbed by BN; mirror the kernel's
            # rounding: stats from f32 conv output, normalization applied to
            # the bf16-rounded y.
            mean = jnp.mean(y, axis=(0, 1, 2))
            var = jnp.mean(jnp.square(y - mean), axis=(0, 1, 2))
            scale = layer["gamma"] * lax.rsqrt(var + 1e-5)
            shift = layer["beta"] - mean * scale
            y_bf = y.astype(jnp.bfloat16).astype(jnp.float32)
            y = y_bf * scale + shift
            y = jnp.where(y >= 0.0, y, layer["neg_slope"] * y)
        else:
            y = y + layer["b"]
        x = y.astype(jnp.float32 if last else jnp.bfloat16)
    return jnp.transpose(x.astype(jnp.float32), (0, 3, 1, 2))


# ----------------------------------------------------------------------------
if __name__ == "__main__":
    key = jax.random.PRNGKey(0)
    pkey, xkey = jax.random.split(key)

    # Small config: num_layers=3, num_filters=8, so a 32x32 input survives the
    # stride-2 cascade (32 -> 16 -> 8 -> 4 -> 3 -> 2). Batch=2, 1 input channel.
    in_channels, num_layers, num_filters = 1, 3, 8
    x = jax.random.normal(xkey, (2, in_channels, 32, 32), dtype=jnp.float32)

    layers = init_patch_discriminator(pkey, in_channels=in_channels,
                                      num_layers=num_layers,
                                      num_filters=num_filters)

    fwd = jax.jit(lambda inp: patch_discriminator_forward(layers, inp))
    out = jax.block_until_ready(fwd(x))
    assert out.shape == (2, 1, 2, 2), out.shape
    assert bool(jnp.all(jnp.isfinite(out)))

    ref = jax.block_until_ready(reference_forward(layers, x))
    err = float(jnp.max(jnp.abs(out - ref)))
    assert err < 2e-2, f"max abs error vs reference: {err}"

    print("KERNEL_OK")
</pallas_src>

<mosaic_0001>
module attributes {stable_mosaic.version = 11 : i64} {
  func.func @gemm_bias_kernel(%arg0: i32, %arg1: i32, %arg2: i32, %arg3: memref<512x128xbf16, #tpu.memory_space<vmem>>, %arg4: memref<128x128xbf16, #tpu.memory_space<vmem>>, %arg5: memref<1x128xf32, #tpu.memory_space<vmem>>, %arg6: memref<512x128xbf16, #tpu.memory_space<vmem>>, %arg7: memref<512x128xf32, #tpu.memory_space<vmem>>) attributes {dimension_semantics = [#tpu.dimension_semantics<parallel>, #tpu.dimension_semantics<parallel>, #tpu.dimension_semantics<arbitrary>], iteration_bounds = array<i64: 1, 1, 1>, scalar_prefetch = 0 : i64, scratch_operands = 1 : i64, tpu.core_type = #tpu.core_type<tc>, window_params = [{transform_indices = @transform_0, window_bounds = array<i64: 512, 128>}, {transform_indices = @transform_1, window_bounds = array<i64: 128, 128>}, {transform_indices = @transform_2, window_bounds = array<i64: 1, 128>}, {transform_indices = @transform_3, window_bounds = array<i64: 512, 128>}]} {
    %c0_i32 = arith.constant 0 : i32
    %0 = arith.cmpi eq, %arg2, %c0_i32 : i32
    %1 = arith.extui %0 : i1 to i32
    %c0_i32_0 = arith.constant 0 : i32
    %2 = arith.cmpi ne, %1, %c0_i32_0 : i32
    scf.if %2 {
      %cst_9 = arith.constant 0.000000e+00 : f32
      %15 = vector.broadcast %cst_9 : f32 to vector<512x128xf32>
      %c0_10 = arith.constant 0 : index
      %c0_11 = arith.constant 0 : index
      %16 = vector.load %arg7[%c0_10, %c0_11] : memref<512x128xf32, #tpu.memory_space<vmem>>, vector<512x128xf32>
      tpu.vector_store %arg7[%c0_10, %c0_11], %15 {strides = array<i32>} : memref<512x128xf32, #tpu.memory_space<vmem>>, vector<512x128xf32>,
    } else {
    }
    %c128_i32 = arith.constant 128 : i32
    %3 = arith.muli %arg2, %c128_i32 : i32
    %4 = tpu.assume_multiple %3, 128 : i32
    %c0 = arith.constant 0 : index
    %c0_1 = arith.constant 0 : index
    %5 = vector.load %arg7[%c0, %c0_1] : memref<512x128xf32, #tpu.memory_space<vmem>>, vector<512x128xf32>
    %c0_2 = arith.constant 0 : index
    %c0_3 = arith.constant 0 : index
    %6 = vector.load %arg3[%c0_2, %c0_3] : memref<512x128xbf16, #tpu.memory_space<vmem>>, vector<512x128xbf16>
    %7 = arith.index_cast %4 : i32 to index
    %c0_4 = arith.constant 0 : index
    %8 = vector.load %arg4[%7, %c0_4] : memref<128x128xbf16, #tpu.memory_space<vmem>>, vector<128x128xbf16>
    %cst = arith.constant dense<0.000000e+00> : vector<512x128xf32>
    %9 = tpu.matmul %6, %8, %cst {dimension_numbers = #tpu.dot_dimension_numbers<[1], [0], [0], [1], [0, 0, 1, 1], [], []>} : vector<512x128xbf16>, vector<128x128xbf16>, vector<512x128xf32> -> vector<512x128xf32>
    %10 = arith.addf %5, %9 : vector<512x128xf32>
    %c0_5 = arith.constant 0 : index
    %c0_6 = arith.constant 0 : index
    %11 = vector.load %arg7[%c0_5, %c0_6] : memref<512x128xf32, #tpu.memory_space<vmem>>, vector<512x128xf32>
    tpu.vector_store %arg7[%c0_5, %c0_6], %10 {strides = array<i32>} : memref<512x128xf32, #tpu.memory_space<vmem>>, vector<512x128xf32>,
    %c0_i32_7 = arith.constant 0 : i32
    %12 = arith.cmpi eq, %arg2, %c0_i32_7 : i32
    %13 = arith.extui %12 : i1 to i32
    %c0_i32_8 = arith.constant 0 : i32
    %14 = arith.cmpi ne, %13, %c0_i32_8 : i32
    scf.if %14 {
      %c0_9 = arith.constant 0 : index
      %c0_10 = arith.constant 0 : index
      %15 = vector.load %arg7[%c0_9, %c0_10] : memref<512x128xf32, #tpu.memory_space<vmem>>, vector<512x128xf32>
      %c0_11 = arith.constant 0 : index
      %c0_12 = arith.constant 0 : index
      %16 = vector.load %arg5[%c0_11, %c0_12] : memref<1x128xf32, #tpu.memory_space<vmem>>, vector<1x128xf32>
      %17 = vector.broadcast %16 : vector<1x128xf32> to vector<512x128xf32>
      %18 = arith.addf %15, %17 : vector<512x128xf32>
      %19 = arith.truncf %18 : vector<512x128xf32> to vector<512x128xbf16>
      %c0_13 = arith.constant 0 : index
      %c0_14 = arith.constant 0 : index
      %20 = vector.load %arg6[%c0_13, %c0_14] : memref<512x128xbf16, #tpu.memory_space<vmem>>, vector<512x128xbf16>
      tpu.vector_store %arg6[%c0_13, %c0_14], %19 {strides = array<i32>} : memref<512x128xbf16, #tpu.memory_space<vmem>>, vector<512x128xbf16>,
    } else {
    }
    return
  }
  func.func @transform_0(%arg0: i32, %arg1: i32, %arg2: i32) -> (i32, i32) {
    %c0_i32 = arith.constant 0 : i32
    return %arg0, %arg2 : i32, i32
  }
  func.func @transform_1(%arg0: i32, %arg1: i32, %arg2: i32) -> (i32, i32) {
    %c0_i32 = arith.constant 0 : i32
    %c0_i32_0 = arith.constant 0 : i32
    return %c0_i32, %arg1 : i32, i32
  }
  func.func @transform_2(%arg0: i32, %arg1: i32, %arg2: i32) -> (i32, i32) {
    %c0_i32 = arith.constant 0 : i32
    %c0_i32_0 = arith.constant 0 : i32
    return %c0_i32, %arg1 : i32, i32
  }
  func.func @transform_3(%arg0: i32, %arg1: i32, %arg2: i32) -> (i32, i32) {
    %c0_i32 = arith.constant 0 : i32
    return %arg0, %arg1 : i32, i32
  }
}

module attributes {stable_mosaic.version = 11 : i64} {
  func.func @gemm_stats_kernel(%arg0: i32, %arg1: i32, %arg2: i32, %arg3: memref<128x512xbf16, #tpu.memory_space<vmem>>, %arg4: memref<2048x128xbf16, #tpu.memory_space<vmem>>, %arg5: memref<128x128xbf16, #tpu.memory_space<vmem>>, %arg6: memref<1x1x128xf32, #tpu.memory_space<vmem>>, %arg7: memref<1x1x128xf32, #tpu.memory_space<vmem>>, %arg8: memref<128x128xf32, #tpu.memory_space<vmem>>) attributes {dimension_semantics = [#tpu.dimension_semantics<parallel>, #tpu.dimension_semantics<parallel>, #tpu.dimension_semantics<arbitrary>], iteration_bounds = array<i64: 1, 1, 4>, scalar_prefetch = 0 : i64, scratch_operands = 1 : i64, tpu.core_type = #tpu.core_type<tc>, window_params = [{transform_indices = @transform_0, window_bounds = array<i64: 128, 512>}, {transform_indices = @transform_1, window_bounds = array<i64: 2048, 128>}, {transform_indices = @transform_2, window_bounds = array<i64: 128, 128>}, {transform_indices = @transform_3, window_bounds = array<i64: 1, 1, 128>}, {transform_indices = @transform_4, window_bounds = array<i64: 1, 1, 128>}]} {
    %c0_i32 = arith.constant 0 : i32
    %0 = arith.cmpi eq, %arg2, %c0_i32 : i32
    %1 = arith.extui %0 : i1 to i32
    %c0_i32_0 = arith.constant 0 : i32
    %2 = arith.cmpi ne, %1, %c0_i32_0 : i32
    scf.if %2 {
      %cst_8 = arith.constant 0.000000e+00 : f32
      %15 = vector.broadcast %cst_8 : f32 to vector<128x128xf32>
      %c0_9 = arith.constant 0 : index
      %c0_10 = arith.constant 0 : index
      %16 = vector.load %arg8[%c0_9, %c0_10] : memref<128x128xf32, #tpu.memory_space<vmem>>, vector<128x128xf32>
      tpu.vector_store %arg8[%c0_9, %c0_10], %15 {strides = array<i32>} : memref<128x128xf32, #tpu.memory_space<vmem>>, vector<128x128xf32>,
    } else {
    }
    %c512_i32 = arith.constant 512 : i32
    %3 = arith.muli %arg2, %c512_i32 : i32
    %4 = tpu.assume_multiple %3, 512 : i32
    %c0 = arith.constant 0 : index
    %c0_1 = arith.constant 0 : index
    %5 = vector.load %arg8[%c0, %c0_1] : memref<128x128xf32, #tpu.memory_space<vmem>>, vector<128x128xf32>
    %c0_2 = arith.constant 0 : index
    %c0_3 = arith.constant 0 : index
    %6 = vector.load %arg3[%c0_2, %c0_3] : memref<128x512xbf16, #tpu.memory_space<vmem>>, vector<128x512xbf16>
    %7 = arith.index_cast %4 : i32 to index
    %c0_4 = arith.constant 0 : index
    %8 = vector.load %arg4[%7, %c0_4] : memref<2048x128xbf16, #tpu.memory_space<vmem>>, vector<512x128xbf16>
    %cst = arith.constant dense<0.000000e+00> : vector<128x128xf32>
    %9 = tpu.matmul %6, %8, %cst {dimension_numbers = #tpu.dot_dimension_numbers<[1], [0], [0], [1], [0, 0, 1, 1], [], []>} : vector<128x512xbf16>, vector<512x128xbf16>, vector<128x128xf32> -> vector<128x128xf32>
    %10 = arith.addf %5, %9 : vector<128x128xf32>
    %c0_5 = arith.constant 0 : index
    %c0_6 = arith.constant 0 : index
    %11 = vector.load %arg8[%c0_5, %c0_6] : memref<128x128xf32, #tpu.memory_space<vmem>>, vector<128x128xf32>
    tpu.vector_store %arg8[%c0_5, %c0_6], %10 {strides = array<i32>} : memref<128x128xf32, #tpu.memory_space<vmem>>, vector<128x128xf32>,
    %c3_i32 = arith.constant 3 : i32
    %12 = arith.cmpi eq, %arg2, %c3_i32 : i32
    %13 = arith.extui %12 : i1 to i32
    %c0_i32_7 = arith.constant 0 : i32
    %14 = arith.cmpi ne, %13, %c0_i32_7 : i32
    scf.if %14 {
      %c0_8 = arith.constant 0 : index
      %c0_9 = arith.constant 0 : index
      %15 = vector.load %arg8[%c0_8, %c0_9] : memref<128x128xf32, #tpu.memory_space<vmem>>, vector<128x128xf32>
      %16 = arith.truncf %15 : vector<128x128xf32> to vector<128x128xbf16>
      %c0_10 = arith.constant 0 : index
      %c0_11 = arith.constant 0 : index
      %17 = vector.load %arg5[%c0_10, %c0_11] : memref<128x128xbf16, #tpu.memory_space<vmem>>, vector<128x128xbf16>
      tpu.vector_store %arg5[%c0_10, %c0_11], %16 {strides = array<i32>} : memref<128x128xbf16, #tpu.memory_space<vmem>>, vector<128x128xbf16>,
      %cst_12 = arith.constant dense<0.000000e+00> : vector<128xf32>
      %18 = vector.multi_reduction <add>, %15, %cst_12 [0] : vector<128x128xf32> to vector<128xf32>
      %19 = vector.shape_cast %18 : vector<128xf32> to vector<1x128xf32>
      %20 = vector.shape_cast %19 : vector<1x128xf32> to vector<1x1x128xf32>
      %c0_13 = arith.constant 0 : index
      %c0_14 = arith.constant 0 : index
      %c0_15 = arith.constant 0 : index
      %21 = vector.load %arg6[%c0_13, %c0_14, %c0_15] : memref<1x1x128xf32, #tpu.memory_space<vmem>>, vector<1x1x128xf32>
      tpu.vector_store %arg6[%c0_13, %c0_14, %c0_15], %20 {strides = array<i32>} : memref<1x1x128xf32, #tpu.memory_space<vmem>>, vector<1x1x128xf32>,
      %22 = arith.mulf %15, %15 : vector<128x128xf32>
      %cst_16 = arith.constant dense<0.000000e+00> : vector<128xf32>
      %23 = vector.multi_reduction <add>, %22, %cst_16 [0] : vector<128x128xf32> to vector<128xf32>
      %24 = vector.shape_cast %23 : vector<128xf32> to vector<1x128xf32>
      %25 = vector.shape_cast %24 : vector<1x128xf32> to vector<1x1x128xf32>
      %c0_17 = arith.constant 0 : index
      %c0_18 = arith.constant 0 : index
      %c0_19 = arith.constant 0 : index
      %26 = vector.load %arg7[%c0_17, %c0_18, %c0_19] : memref<1x1x128xf32, #tpu.memory_space<vmem>>, vector<1x1x128xf32>
      tpu.vector_store %arg7[%c0_17, %c0_18, %c0_19], %25 {strides = array<i32>} : memref<1x1x128xf32, #tpu.memory_space<vmem>>, vector<1x1x128xf32>,
    } else {
    }
    return
  }
  func.func @transform_0(%arg0: i32, %arg1: i32, %arg2: i32) -> (i32, i32) {
    %c0_i32 = arith.constant 0 : i32
    return %arg0, %arg2 : i32, i32
  }
  func.func @transform_1(%arg0: i32, %arg1: i32, %arg2: i32) -> (i32, i32) {
    %c0_i32 = arith.constant 0 : i32
    %c0_i32_0 = arith.constant 0 : i32
    return %c0_i32, %arg1 : i32, i32
  }
  func.func @transform_2(%arg0: i32, %arg1: i32, %arg2: i32) -> (i32, i32) {
    %c0_i32 = arith.constant 0 : i32
    return %arg0, %arg1 : i32, i32
  }
  func.func @transform_3(%arg0: i32, %arg1: i32, %arg2: i32) -> (i32, i32, i32) {
    %c0_i32 = arith.constant 0 : i32
    %c0_i32_0 = arith.constant 0 : i32
    return %arg0, %c0_i32, %arg1 : i32, i32, i32
  }
  func.func @transform_4(%arg0: i32, %arg1: i32, %arg2: i32) -> (i32, i32, i32) {
    %c0_i32 = arith.constant 0 : i32
    %c0_i32_0 = arith.constant 0 : i32
    return %arg0, %c0_i32, %arg1 : i32, i32, i32
  }
}

module attributes {stable_mosaic.version = 11 : i64} {
  func.func @bn_lrelu_kernel(%arg0: i32, %arg1: i32, %arg2: memref<128x128xbf16, #tpu.memory_space<vmem>>, %arg3: memref<1x128xf32, #tpu.memory_space<vmem>>, %arg4: memref<1x128xf32, #tpu.memory_space<vmem>>, %arg5: memref<128x128xbf16, #tpu.memory_space<vmem>>) attributes {dimension_semantics = [#tpu.dimension_semantics<parallel>, #tpu.dimension_semantics<parallel>], iteration_bounds = array<i64: 1, 1>, scalar_prefetch = 0 : i64, scratch_operands = 0 : i64, tpu.core_type = #tpu.core_type<tc>, window_params = [{transform_indices = @transform_0, window_bounds = array<i64: 128, 128>}, {transform_indices = @transform_1, window_bounds = array<i64: 1, 128>}, {transform_indices = @transform_2, window_bounds = array<i64: 1, 128>}, {transform_indices = @transform_3, window_bounds = array<i64: 128, 128>}]} {
    %c0 = arith.constant 0 : index
    %c0_0 = arith.constant 0 : index
    %0 = vector.load %arg2[%c0, %c0_0] : memref<128x128xbf16, #tpu.memory_space<vmem>>, vector<128x128xbf16>
    %1 = arith.extf %0 : vector<128x128xbf16> to vector<128x128xf32>
    %c0_1 = arith.constant 0 : index
    %c0_2 = arith.constant 0 : index
    %2 = vector.load %arg3[%c0_1, %c0_2] : memref<1x128xf32, #tpu.memory_space<vmem>>, vector<1x128xf32>
    %3 = vector.broadcast %2 : vector<1x128xf32> to vector<128x128xf32>
    %4 = arith.mulf %1, %3 : vector<128x128xf32>
    %c0_3 = arith.constant 0 : index
    %c0_4 = arith.constant 0 : index
    %5 = vector.load %arg4[%c0_3, %c0_4] : memref<1x128xf32, #tpu.memory_space<vmem>>, vector<1x128xf32>
    %6 = vector.broadcast %5 : vector<1x128xf32> to vector<128x128xf32>
    %7 = arith.addf %4, %6 : vector<128x128xf32>
    %cst = arith.constant 0.000000e+00 : f32
    %8 = vector.broadcast %cst : f32 to vector<128x128xf32>
    %9 = arith.cmpf oge, %7, %8 : vector<128x128xf32>
    %cst_5 = arith.constant 2.000000e-01 : f32
    %10 = vector.broadcast %cst_5 : f32 to vector<128x128xf32>
    %11 = arith.mulf %10, %7 : vector<128x128xf32>
    %12 = arith.select %9, %7, %11 : vector<128x128xi1>, vector<128x128xf32>
    %13 = arith.truncf %12 : vector<128x128xf32> to vector<128x128xbf16>
    %c0_6 = arith.constant 0 : index
    %c0_7 = arith.constant 0 : index
    %14 = vector.load %arg5[%c0_6, %c0_7] : memref<128x128xbf16, #tpu.memory_space<vmem>>, vector<128x128xbf16>
    tpu.vector_store %arg5[%c0_6, %c0_7], %13 {strides = array<i32>} : memref<128x128xbf16, #tpu.memory_space<vmem>>, vector<128x128xbf16>,
    return
  }
  func.func @transform_0(%arg0: i32, %arg1: i32) -> (i32, i32) {
    %c0_i32 = arith.constant 0 : i32
    return %arg0, %arg1 : i32, i32
  }
  func.func @transform_1(%arg0: i32, %arg1: i32) -> (i32, i32) {
    %c0_i32 = arith.constant 0 : i32
    %c0_i32_0 = arith.constant 0 : i32
    return %c0_i32, %arg1 : i32, i32
  }
  func.func @transform_2(%arg0: i32, %arg1: i32) -> (i32, i32) {
    %c0_i32 = arith.constant 0 : i32
    %c0_i32_0 = arith.constant 0 : i32
    return %c0_i32, %arg1 : i32, i32
  }
  func.func @transform_3(%arg0: i32, %arg1: i32) -> (i32, i32) {
    %c0_i32 = arith.constant 0 : i32
    return %arg0, %arg1 : i32, i32
  }
}

module attributes {stable_mosaic.version = 11 : i64} {
  func.func @gemm_stats_kernel(%arg0: i32, %arg1: i32, %arg2: i32, %arg3: memref<32x512xbf16, #tpu.memory_space<vmem>>, %arg4: memref<2048x128xbf16, #tpu.memory_space<vmem>>, %arg5: memref<32x128xbf16, #tpu.memory_space<vmem>>, %arg6: memref<1x1x128xf32, #tpu.memory_space<vmem>>, %arg7: memref<1x1x128xf32, #tpu.memory_space<vmem>>, %arg8: memref<32x128xf32, #tpu.memory_space<vmem>>) attributes {dimension_semantics = [#tpu.dimension_semantics<parallel>, #tpu.dimension_semantics<parallel>, #tpu.dimension_semantics<arbitrary>], iteration_bounds = array<i64: 1, 1, 4>, scalar_prefetch = 0 : i64, scratch_operands = 1 : i64, tpu.core_type = #tpu.core_type<tc>, window_params = [{transform_indices = @transform_0, window_bounds = array<i64: 32, 512>}, {transform_indices = @transform_1, window_bounds = array<i64: 2048, 128>}, {transform_indices = @transform_2, window_bounds = array<i64: 32, 128>}, {transform_indices = @transform_3, window_bounds = array<i64: 1, 1, 128>}, {transform_indices = @transform_4, window_bounds = array<i64: 1, 1, 128>}]} {
    %c0_i32 = arith.constant 0 : i32
    %0 = arith.cmpi eq, %arg2, %c0_i32 : i32
    %1 = arith.extui %0 : i1 to i32
    %c0_i32_0 = arith.constant 0 : i32
    %2 = arith.cmpi ne, %1, %c0_i32_0 : i32
    scf.if %2 {
      %cst_8 = arith.constant 0.000000e+00 : f32
      %15 = vector.broadcast %cst_8 : f32 to vector<32x128xf32>
      %c0_9 = arith.constant 0 : index
      %c0_10 = arith.constant 0 : index
      %16 = vector.load %arg8[%c0_9, %c0_10] : memref<32x128xf32, #tpu.memory_space<vmem>>, vector<32x128xf32>
      tpu.vector_store %arg8[%c0_9, %c0_10], %15 {strides = array<i32>} : memref<32x128xf32, #tpu.memory_space<vmem>>, vector<32x128xf32>,
    } else {
    }
    %c512_i32 = arith.constant 512 : i32
    %3 = arith.muli %arg2, %c512_i32 : i32
    %4 = tpu.assume_multiple %3, 512 : i32
    %c0 = arith.constant 0 : index
    %c0_1 = arith.constant 0 : index
    %5 = vector.load %arg8[%c0, %c0_1] : memref<32x128xf32, #tpu.memory_space<vmem>>, vector<32x128xf32>
    %c0_2 = arith.constant 0 : index
    %c0_3 = arith.constant 0 : index
    %6 = vector.load %arg3[%c0_2, %c0_3] : memref<32x512xbf16, #tpu.memory_space<vmem>>, vector<32x512xbf16>
    %7 = arith.index_cast %4 : i32 to index
    %c0_4 = arith.constant 0 : index
    %8 = vector.load %arg4[%7, %c0_4] : memref<2048x128xbf16, #tpu.memory_space<vmem>>, vector<512x128xbf16>
    %cst = arith.constant dense<0.000000e+00> : vector<32x128xf32>
    %9 = tpu.matmul %6, %8, %cst {dimension_numbers = #tpu.dot_dimension_numbers<[1], [0], [0], [1], [0, 0, 1, 1], [], []>} : vector<32x512xbf16>, vector<512x128xbf16>, vector<32x128xf32> -> vector<32x128xf32>
    %10 = arith.addf %5, %9 : vector<32x128xf32>
    %c0_5 = arith.constant 0 : index
    %c0_6 = arith.constant 0 : index
    %11 = vector.load %arg8[%c0_5, %c0_6] : memref<32x128xf32, #tpu.memory_space<vmem>>, vector<32x128xf32>
    tpu.vector_store %arg8[%c0_5, %c0_6], %10 {strides = array<i32>} : memref<32x128xf32, #tpu.memory_space<vmem>>, vector<32x128xf32>,
    %c3_i32 = arith.constant 3 : i32
    %12 = arith.cmpi eq, %arg2, %c3_i32 : i32
    %13 = arith.extui %12 : i1 to i32
    %c0_i32_7 = arith.constant 0 : i32
    %14 = arith.cmpi ne, %13, %c0_i32_7 : i32
    scf.if %14 {
      %c0_8 = arith.constant 0 : index
      %c0_9 = arith.constant 0 : index
      %15 = vector.load %arg8[%c0_8, %c0_9] : memref<32x128xf32, #tpu.memory_space<vmem>>, vector<32x128xf32>
      %16 = arith.truncf %15 : vector<32x128xf32> to vector<32x128xbf16>
      %c0_10 = arith.constant 0 : index
      %c0_11 = arith.constant 0 : index
      %17 = vector.load %arg5[%c0_10, %c0_11] : memref<32x128xbf16, #tpu.memory_space<vmem>>, vector<32x128xbf16>
      tpu.vector_store %arg5[%c0_10, %c0_11], %16 {strides = array<i32>} : memref<32x128xbf16, #tpu.memory_space<vmem>>, vector<32x128xbf16>,
      %cst_12 = arith.constant dense<0.000000e+00> : vector<128xf32>
      %18 = vector.multi_reduction <add>, %15, %cst_12 [0] : vector<32x128xf32> to vector<128xf32>
      %19 = vector.shape_cast %18 : vector<128xf32> to vector<1x128xf32>
      %20 = vector.shape_cast %19 : vector<1x128xf32> to vector<1x1x128xf32>
      %c0_13 = arith.constant 0 : index
      %c0_14 = arith.constant 0 : index
      %c0_15 = arith.constant 0 : index
      %21 = vector.load %arg6[%c0_13, %c0_14, %c0_15] : memref<1x1x128xf32, #tpu.memory_space<vmem>>, vector<1x1x128xf32>
      tpu.vector_store %arg6[%c0_13, %c0_14, %c0_15], %20 {strides = array<i32>} : memref<1x1x128xf32, #tpu.memory_space<vmem>>, vector<1x1x128xf32>,
      %22 = arith.mulf %15, %15 : vector<32x128xf32>
      %cst_16 = arith.constant dense<0.000000e+00> : vector<128xf32>
      %23 = vector.multi_reduction <add>, %22, %cst_16 [0] : vector<32x128xf32> to vector<128xf32>
      %24 = vector.shape_cast %23 : vector<128xf32> to vector<1x128xf32>
      %25 = vector.shape_cast %24 : vector<1x128xf32> to vector<1x1x128xf32>
      %c0_17 = arith.constant 0 : index
      %c0_18 = arith.constant 0 : index
      %c0_19 = arith.constant 0 : index
      %26 = vector.load %arg7[%c0_17, %c0_18, %c0_19] : memref<1x1x128xf32, #tpu.memory_space<vmem>>, vector<1x1x128xf32>
      tpu.vector_store %arg7[%c0_17, %c0_18, %c0_19], %25 {strides = array<i32>} : memref<1x1x128xf32, #tpu.memory_space<vmem>>, vector<1x1x128xf32>,
    } else {
    }
    return
  }
  func.func @transform_0(%arg0: i32, %arg1: i32, %arg2: i32) -> (i32, i32) {
    %c0_i32 = arith.constant 0 : i32
    return %arg0, %arg2 : i32, i32
  }
  func.func @transform_1(%arg0: i32, %arg1: i32, %arg2: i32) -> (i32, i32) {
    %c0_i32 = arith.constant 0 : i32
    %c0_i32_0 = arith.constant 0 : i32
    return %c0_i32, %arg1 : i32, i32
  }
  func.func @transform_2(%arg0: i32, %arg1: i32, %arg2: i32) -> (i32, i32) {
    %c0_i32 = arith.constant 0 : i32
    return %arg0, %arg1 : i32, i32
  }
  func.func @transform_3(%arg0: i32, %arg1: i32, %arg2: i32) -> (i32, i32, i32) {
    %c0_i32 = arith.constant 0 : i32
    %c0_i32_0 = arith.constant 0 : i32
    return %arg0, %c0_i32, %arg1 : i32, i32, i32
  }
  func.func @transform_4(%arg0: i32, %arg1: i32, %arg2: i32) -> (i32, i32, i32) {
    %c0_i32 = arith.constant 0 : i32
    %c0_i32_0 = arith.constant 0 : i32
    return %arg0, %c0_i32, %arg1 : i32, i32, i32
  }
}

module attributes {stable_mosaic.version = 11 : i64} {
  func.func @bn_lrelu_kernel(%arg0: i32, %arg1: i32, %arg2: memref<32x128xbf16, #tpu.memory_space<vmem>>, %arg3: memref<1x128xf32, #tpu.memory_space<vmem>>, %arg4: memref<1x128xf32, #tpu.memory_space<vmem>>, %arg5: memref<32x128xbf16, #tpu.memory_space<vmem>>) attributes {dimension_semantics = [#tpu.dimension_semantics<parallel>, #tpu.dimension_semantics<parallel>], iteration_bounds = array<i64: 1, 1>, scalar_prefetch = 0 : i64, scratch_operands = 0 : i64, tpu.core_type = #tpu.core_type<tc>, window_params = [{transform_indices = @transform_0, window_bounds = array<i64: 32, 128>}, {transform_indices = @transform_1, window_bounds = array<i64: 1, 128>}, {transform_indices = @transform_2, window_bounds = array<i64: 1, 128>}, {transform_indices = @transform_3, window_bounds = array<i64: 32, 128>}]} {
    %c0 = arith.constant 0 : index
    %c0_0 = arith.constant 0 : index
    %0 = vector.load %arg2[%c0, %c0_0] : memref<32x128xbf16, #tpu.memory_space<vmem>>, vector<32x128xbf16>
    %1 = arith.extf %0 : vector<32x128xbf16> to vector<32x128xf32>
    %c0_1 = arith.constant 0 : index
    %c0_2 = arith.constant 0 : index
    %2 = vector.load %arg3[%c0_1, %c0_2] : memref<1x128xf32, #tpu.memory_space<vmem>>, vector<1x128xf32>
    %3 = vector.broadcast %2 : vector<1x128xf32> to vector<32x128xf32>
    %4 = arith.mulf %1, %3 : vector<32x128xf32>
    %c0_3 = arith.constant 0 : index
    %c0_4 = arith.constant 0 : index
    %5 = vector.load %arg4[%c0_3, %c0_4] : memref<1x128xf32, #tpu.memory_space<vmem>>, vector<1x128xf32>
    %6 = vector.broadcast %5 : vector<1x128xf32> to vector<32x128xf32>
    %7 = arith.addf %4, %6 : vector<32x128xf32>
    %cst = arith.constant 0.000000e+00 : f32
    %8 = vector.broadcast %cst : f32 to vector<32x128xf32>
    %9 = arith.cmpf oge, %7, %8 : vector<32x128xf32>
    %cst_5 = arith.constant 2.000000e-01 : f32
    %10 = vector.broadcast %cst_5 : f32 to vector<32x128xf32>
    %11 = arith.mulf %10, %7 : vector<32x128xf32>
    %12 = arith.select %9, %7, %11 : vector<32x128xi1>, vector<32x128xf32>
    %13 = arith.truncf %12 : vector<32x128xf32> to vector<32x128xbf16>
    %c0_6 = arith.constant 0 : index
    %c0_7 = arith.constant 0 : index
    %14 = vector.load %arg5[%c0_6, %c0_7] : memref<32x128xbf16, #tpu.memory_space<vmem>>, vector<32x128xbf16>
    tpu.vector_store %arg5[%c0_6, %c0_7], %13 {strides = array<i32>} : memref<32x128xbf16, #tpu.memory_space<vmem>>, vector<32x128xbf16>,
    return
  }
  func.func @transform_0(%arg0: i32, %arg1: i32) -> (i32, i32) {
    %c0_i32 = arith.constant 0 : i32
    return %arg0, %arg1 : i32, i32
  }
  func.func @transform_1(%arg0: i32, %arg1: i32) -> (i32, i32) {
    %c0_i32 = arith.constant 0 : i32
    %c0_i32_0 = arith.constant 0 : i32
    return %c0_i32, %arg1 : i32, i32
  }
  func.func @transform_2(%arg0: i32, %arg1: i32) -> (i32, i32) {
    %c0_i32 = arith.constant 0 : i32
    %c0_i32_0 = arith.constant 0 : i32
    return %c0_i32, %arg1 : i32, i32
  }
  func.func @transform_3(%arg0: i32, %arg1: i32) -> (i32, i32) {
    %c0_i32 = arith.constant 0 : i32
    return %arg0, %arg1 : i32, i32
  }
}

module attributes {stable_mosaic.version = 11 : i64} {
  func.func @gemm_bias_kernel(%arg0: i32, %arg1: i32, %arg2: i32, %arg3: memref<16x512xbf16, #tpu.memory_space<vmem>>, %arg4: memref<2048x128xbf16, #tpu.memory_space<vmem>>, %arg5: memref<1x128xf32, #tpu.memory_space<vmem>>, %arg6: memref<16x128xf32, #tpu.memory_space<vmem>>, %arg7: memref<16x128xf32, #tpu.memory_space<vmem>>) attributes {dimension_semantics = [#tpu.dimension_semantics<parallel>, #tpu.dimension_semantics<parallel>, #tpu.dimension_semantics<arbitrary>], iteration_bounds = array<i64: 1, 1, 4>, scalar_prefetch = 0 : i64, scratch_operands = 1 : i64, tpu.core_type = #tpu.core_type<tc>, window_params = [{transform_indices = @transform_0, window_bounds = array<i64: 16, 512>}, {transform_indices = @transform_1, window_bounds = array<i64: 2048, 128>}, {transform_indices = @transform_2, window_bounds = array<i64: 1, 128>}, {transform_indices = @transform_3, window_bounds = array<i64: 16, 128>}]} {
    %c0_i32 = arith.constant 0 : i32
    %0 = arith.cmpi eq, %arg2, %c0_i32 : i32
    %1 = arith.extui %0 : i1 to i32
    %c0_i32_0 = arith.constant 0 : i32
    %2 = arith.cmpi ne, %1, %c0_i32_0 : i32
    scf.if %2 {
      %cst_8 = arith.constant 0.000000e+00 : f32
      %15 = vector.broadcast %cst_8 : f32 to vector<16x128xf32>
      %c0_9 = arith.constant 0 : index
      %c0_10 = arith.constant 0 : index
      %16 = vector.load %arg7[%c0_9, %c0_10] : memref<16x128xf32, #tpu.memory_space<vmem>>, vector<16x128xf32>
      tpu.vector_store %arg7[%c0_9, %c0_10], %15 {strides = array<i32>} : memref<16x128xf32, #tpu.memory_space<vmem>>, vector<16x128xf32>,
    } else {
    }
    %c512_i32 = arith.constant 512 : i32
    %3 = arith.muli %arg2, %c512_i32 : i32
    %4 = tpu.assume_multiple %3, 512 : i32
    %c0 = arith.constant 0 : index
    %c0_1 = arith.constant 0 : index
    %5 = vector.load %arg7[%c0, %c0_1] : memref<16x128xf32, #tpu.memory_space<vmem>>, vector<16x128xf32>
    %c0_2 = arith.constant 0 : index
    %c0_3 = arith.constant 0 : index
    %6 = vector.load %arg3[%c0_2, %c0_3] : memref<16x512xbf16, #tpu.memory_space<vmem>>, vector<16x512xbf16>
    %7 = arith.index_cast %4 : i32 to index
    %c0_4 = arith.constant 0 : index
    %8 = vector.load %arg4[%7, %c0_4] : memref<2048x128xbf16, #tpu.memory_space<vmem>>, vector<512x128xbf16>
    %cst = arith.constant dense<0.000000e+00> : vector<16x128xf32>
    %9 = tpu.matmul %6, %8, %cst {dimension_numbers = #tpu.dot_dimension_numbers<[1], [0], [0], [1], [0, 0, 1, 1], [], []>} : vector<16x512xbf16>, vector<512x128xbf16>, vector<16x128xf32> -> vector<16x128xf32>
    %10 = arith.addf %5, %9 : vector<16x128xf32>
    %c0_5 = arith.constant 0 : index
    %c0_6 = arith.constant 0 : index
    %11 = vector.load %arg7[%c0_5, %c0_6] : memref<16x128xf32, #tpu.memory_space<vmem>>, vector<16x128xf32>
    tpu.vector_store %arg7[%c0_5, %c0_6], %10 {strides = array<i32>} : memref<16x128xf32, #tpu.memory_space<vmem>>, vector<16x128xf32>,
    %c3_i32 = arith.constant 3 : i32
    %12 = arith.cmpi eq, %arg2, %c3_i32 : i32
    %13 = arith.extui %12 : i1 to i32
    %c0_i32_7 = arith.constant 0 : i32
    %14 = arith.cmpi ne, %13, %c0_i32_7 : i32
    scf.if %14 {
      %c0_8 = arith.constant 0 : index
      %c0_9 = arith.constant 0 : index
      %15 = vector.load %arg7[%c0_8, %c0_9] : memref<16x128xf32, #tpu.memory_space<vmem>>, vector<16x128xf32>
      %c0_10 = arith.constant 0 : index
      %c0_11 = arith.constant 0 : index
      %16 = vector.load %arg5[%c0_10, %c0_11] : memref<1x128xf32, #tpu.memory_space<vmem>>, vector<1x128xf32>
      %17 = vector.broadcast %16 : vector<1x128xf32> to vector<16x128xf32>
      %18 = arith.addf %15, %17 : vector<16x128xf32>
      %c0_12 = arith.constant 0 : index
      %c0_13 = arith.constant 0 : index
      %19 = vector.load %arg6[%c0_12, %c0_13] : memref<16x128xf32, #tpu.memory_space<vmem>>, vector<16x128xf32>
      tpu.vector_store %arg6[%c0_12, %c0_13], %18 {strides = array<i32>} : memref<16x128xf32, #tpu.memory_space<vmem>>, vector<16x128xf32>,
    } else {
    }
    return
  }
  func.func @transform_0(%arg0: i32, %arg1: i32, %arg2: i32) -> (i32, i32) {
    %c0_i32 = arith.constant 0 : i32
    return %arg0, %arg2 : i32, i32
  }
  func.func @transform_1(%arg0: i32, %arg1: i32, %arg2: i32) -> (i32, i32) {
    %c0_i32 = arith.constant 0 : i32
    %c0_i32_0 = arith.constant 0 : i32
    return %c0_i32, %arg1 : i32, i32
  }
  func.func @transform_2(%arg0: i32, %arg1: i32, %arg2: i32) -> (i32, i32) {
    %c0_i32 = arith.constant 0 : i32
    %c0_i32_0 = arith.constant 0 : i32
    return %c0_i32, %arg1 : i32, i32
  }
  func.func @transform_3(%arg0: i32, %arg1: i32, %arg2: i32) -> (i32, i32) {
    %c0_i32 = arith.constant 0 : i32
    return %arg0, %arg1 : i32, i32
  }
}

</mosaic_0001>

<bundles_post_ra>
// kernel: _lambda_.8
= control target key start
LH: loop header
LB: loop body
LE: loop exit
PB: predicated region body
PF: predicated region fallthrough
CT: control target
= control target key end

     0   :  { %s2194_s1 = inlined_call_operand.vmem [shape: bf16[128,128], index: 1, kind: input, shape index: {}]   ;;  %s2195_s0 = inlined_call_operand.vmem [shape: bf16[512,128], index: 0, kind: input, shape index: {}]   ;;  %s2196_s2 = inlined_call_operand.vmem [shape: f32[1,128], index: 2, kind: input, shape index: {}]   ;;  %s2197_s3 = inlined_call_operand.vmem [shape: bf16[512,128], index: 3, kind: output, shape index: {}]  }
   0x1   :  { %v1849_v0 = vld [vmem:[%s2194_s1] sm:$0xff]   ;;  %v1850_v1 = vld [vmem:[%s2194_s1 + $0x8] sm:$0xff]   ;;  %v1851_v2 = vld [vmem:[%s2194_s1 + $0x10] sm:$0xff]  }
   0x2   :  { %1753 = vmatprep.subr.bf16.mxu0 %v1849_v0  ;;  %1833 = vmatprep.subr.bf16.mxu1 %v1849_v0  ;;  %v1852_v3 = vld [vmem:[%s2194_s1 + $0x18] sm:$0xff]   ;;  %v1857_v4 = vld [vmem:[%s2195_s0] sm:$0xff]   ;;  %v1854_v7 = vld [vmem:[%s2194_s1 + $0x28] sm:$0xff]  }
   0x3   :  { %1754 = vmatpush3.bf16.msra.mxu0 %v1849_v0  ;;  %1841 = vmatpush3.bf16.msra.mxu1 %v1849_v0  ;;  %v1858_v5 = vld [vmem:[%s2195_s0 + $0x80] sm:$0xff]   ;;  %v1855_v8 = vld [vmem:[%s2194_s1 + $0x30] sm:$0xff]   ;;  %v1856_v9 = vld [vmem:[%s2194_s1 + $0x38] sm:$0xff]  }
   0x4   :  { %1755 = vmatprep.subr.bf16.mxu0 %v1850_v1  ;;  %1834 = vmatprep.subr.bf16.mxu1 %v1850_v1  ;;  %v1853_v6 = vld [vmem:[%s2194_s1 + $0x20] sm:$0xff]   ;;  %v1859_v10 = vld [vmem:[%s2195_s0 + $0x8] sm:$0xff]   ;;  %v1861_v12 = vld [vmem:[%s2195_s0 + $0x10] sm:$0xff]  }
   0x5   :  { %1769 = vmatprep.mubr.bf16.mxu0 %v1857_v4  ;;  %1801 = vmatprep.mubr.bf16.mxu1 %v1858_v5  ;;  %v1860_v11 = vld [vmem:[%s2195_s0 + $0x88] sm:$0xff]   ;;  %v1862_v13 = vld [vmem:[%s2195_s0 + $0x90] sm:$0xff]   ;;  %v1863_v14 = vld [vmem:[%s2195_s0 + $0x18] sm:$0xff]  }
   0x6   :  { %v1864_v15 = vld [vmem:[%s2195_s0 + $0x98] sm:$0xff]   ;;  %v1865_v16 = vld [vmem:[%s2195_s0 + $0x20] sm:$0xff]   ;;  %v1867_v18 = vld [vmem:[%s2195_s0 + $0x28] sm:$0xff]  }
   0x7   :  { %1756 = vmatpush3.bf16.msra.mxu0 %v1850_v1  ;;  %1842 = vmatpush3.bf16.msra.mxu1 %v1850_v1  ;;  %v1866_v17 = vld [vmem:[%s2195_s0 + $0xa0] sm:$0xff]   ;;  %v1868_v19 = vld [vmem:[%s2195_s0 + $0xa8] sm:$0xff]   ;;  %v1869_v20 = vld [vmem:[%s2195_s0 + $0x30] sm:$0xff]  }
   0x8   :  { %1757 = vmatprep.subr.bf16.mxu0 %v1851_v2  ;;  %1835 = vmatprep.subr.bf16.mxu1 %v1851_v2  ;;  %v1870_v21 = vld [vmem:[%s2195_s0 + $0xb0] sm:$0xff]   ;;  %v1871_v22 = vld [vmem:[%s2195_s0 + $0x38] sm:$0xff]   ;;  %v1873_v24 = vld [vmem:[%s2195_s0 + $0x40] sm:$0xff]  }
   0x9   :  { %v1872_v23 = vld [vmem:[%s2195_s0 + $0xb8] sm:$0xff]   ;;  %v1874_v25 = vld [vmem:[%s2195_s0 + $0xc0] sm:$0xff]   ;;  %v1875_v26 = vld [vmem:[%s2195_s0 + $0x48] sm:$0xff]  }
   0xa   :  { %v1876_v27 = vld [vmem:[%s2195_s0 + $0xc8] sm:$0xff]   ;;  %v1877_v28 = vld [vmem:[%s2195_s0 + $0x50] sm:$0xff]   ;;  %v1879_v30 = vld [vmem:[%s2195_s0 + $0x58] sm:$0xff]  }
   0xb   :  { %1758 = vmatpush3.bf16.msra.mxu0 %v1851_v2  ;;  %1843 = vmatpush3.bf16.msra.mxu1 %v1851_v2  ;;  %v1878_v29 = vld [vmem:[%s2195_s0 + $0xd0] sm:$0xff]   ;;  %v1880_v31 = vld [vmem:[%s2195_s0 + $0xd8] sm:$0xff]   ;;  %v1881_v32 = vld [vmem:[%s2195_s0 + $0x60] sm:$0xff]  }
   0xc   :  { %1759 = vmatprep.subr.bf16.mxu0 %v1852_v3  ;;  %1836 = vmatprep.subr.bf16.mxu1 %v1852_v3  ;;  %v1882_v33 = vld [vmem:[%s2195_s0 + $0xe0] sm:$0xff]   ;;  %v1883_v34 = vld [vmem:[%s2195_s0 + $0x68] sm:$0xff]   ;;  %v1885_v36 = vld [vmem:[%s2195_s0 + $0x70] sm:$0xff]  }
   0xd   :  { %v1884_v35 = vld [vmem:[%s2195_s0 + $0xe8] sm:$0xff]   ;;  %v1886_v37 = vld [vmem:[%s2195_s0 + $0xf0] sm:$0xff]   ;;  %v1887_v38 = vld [vmem:[%s2195_s0 + $0x78] sm:$0xff]  }
   0xe   :  { %v1888_v39 = vld [vmem:[%s2195_s0 + $0xf8] sm:$0xff]   ;;  %v2032_v41 = vld [vmem:[%s2196_s2] ss:$0 sm:$0xff] }
   0xf   :  { %1760 = vmatpush3.bf16.msra.mxu0 %v1852_v3  ;;  %1844 = vmatpush3.bf16.msra.mxu1 %v1852_v3 }
  0x10   :  { %1761 = vmatprep.subr.bf16.mxu0 %v1853_v6  ;;  %1837 = vmatprep.subr.bf16.mxu1 %v1853_v6 }
  0x13   :  { %1762 = vmatpush3.bf16.msra.mxu0 %v1853_v6  ;;  %1845 = vmatpush3.bf16.msra.mxu1 %v1853_v6 }
  0x14   :  { %1763 = vmatprep.subr.bf16.mxu0 %v1854_v7  ;;  %1838 = vmatprep.subr.bf16.mxu1 %v1854_v7 }
  0x17   :  { %1764 = vmatpush3.bf16.msra.mxu0 %v1854_v7  ;;  %1846 = vmatpush3.bf16.msra.mxu1 %v1854_v7 }
  0x18   :  { %1765 = vmatprep.subr.bf16.mxu0 %v1855_v8  ;;  %1839 = vmatprep.subr.bf16.mxu1 %v1855_v8 }
  0x1b   :  { %1766 = vmatpush3.bf16.msra.mxu0 %v1855_v8  ;;  %1847 = vmatpush3.bf16.msra.mxu1 %v1855_v8 }
  0x1c   :  { %1767 = vmatprep.subr.bf16.mxu0 %v1856_v9  ;;  %1840 = vmatprep.subr.bf16.mxu1 %v1856_v9 }
  0x1f   :  { %1768 = vmatpush3.bf16.msra.mxu0 %v1856_v9  ;;  %1848 = vmatpush3.bf16.msra.mxu1 %v1856_v9 }
  0x22   :  { %1770 = vmatmul.mubr.bf16.vlgmr.msra.gmra.mrb[0].mxu0 %v1859_v10  ;;  %1802 = vmatmul.mubr.bf16.vlgmr.msra.gmra.mrb[0].mxu1 %v1860_v11 }
  0x23   :  { %1773 = vmatprep.mubr.bf16.mxu0 %v1861_v12  ;;  %1805 = vmatprep.mubr.bf16.mxu1 %v1862_v13 }
  0x2a   :  { %1774 = vmatmul.mubr.bf16.gmra.mrb[4].mxu0 %v1863_v14  ;;  %1806 = vmatmul.mubr.bf16.gmra.mrb[4].mxu1 %v1864_v15 }
  0x2b   :  { %1777 = vmatprep.mubr.bf16.mxu0 %v1865_v16  ;;  %1809 = vmatprep.mubr.bf16.mxu1 %v1866_v17 }
  0x32   :  { %1778 = vmatmul.mubr.bf16.gmra.mrb[8].mxu0 %v1867_v18  ;;  %1810 = vmatmul.mubr.bf16.gmra.mrb[8].mxu1 %v1868_v19 }
  0x33   :  { %1781 = vmatprep.mubr.bf16.mxu0 %v1869_v20  ;;  %1813 = vmatprep.mubr.bf16.mxu1 %v1870_v21 }
  0x3a   :  { %1782 = vmatmul.mubr.bf16.gmra.mrb[12].mxu0 %v1871_v22  ;;  %1814 = vmatmul.mubr.bf16.gmra.mrb[12].mxu1 %v1872_v23 }
  0x3b   :  { %1785 = vmatprep.mubr.bf16.mxu0 %v1873_v24  ;;  %1817 = vmatprep.mubr.bf16.mxu1 %v1874_v25 }
  0x42   :  { %1786 = vmatmul.mubr.bf16.gmra.mrb[16].mxu0 %v1875_v26  ;;  %1818 = vmatmul.mubr.bf16.gmra.mrb[16].mxu1 %v1876_v27 }
  0x43   :  { %1789 = vmatprep.mubr.bf16.mxu0 %v1877_v28  ;;  %1821 = vmatprep.mubr.bf16.mxu1 %v1878_v29 }
  0x4a   :  { %1790 = vmatmul.mubr.bf16.gmra.mrb[20].mxu0 %v1879_v30  ;;  %1822 = vmatmul.mubr.bf16.gmra.mrb[20].mxu1 %v1880_v31 }
  0x4b   :  { %1793 = vmatprep.mubr.bf16.mxu0 %v1881_v32  ;;  %1825 = vmatprep.mubr.bf16.mxu1 %v1882_v33 }
  0x52   :  { %1794 = vmatmul.mubr.bf16.gmra.mrb[24].mxu0 %v1883_v34  ;;  %1826 = vmatmul.mubr.bf16.gmra.mrb[24].mxu1 %v1884_v35 }
  0x53   :  { %1797 = vmatprep.mubr.bf16.mxu0 %v1885_v36  ;;  %1829 = vmatprep.mubr.bf16.mxu1 %v1886_v37 }
  0x5a   :  { %1798 = vmatmul.mubr.bf16.gmra.mrb[28].mxu0 %v1887_v38  ;;  %1830 = vmatmul.mubr.bf16.gmra.mrb[28].mxu1 %v1888_v39 }
  0xf5   :  { %v1771_v40 = vpop.f32.mrb[0].mxu0  ;;  %v1803_v42 = vpop.f32.mrb[0].mxu1 }
  0xf6   :  { %v506_v43 = vpop.f32.mrb[1].mxu0  ;;  %v634_v44 = vpop.f32.mrb[1].mxu1  ;;  %v965_v47 = vadd.f32 %v1771_v40, %v2032_v41  ;;  %v997_v48 = vadd.f32 %v1803_v42, %v2032_v41 }
  0xf7   :  { %v1772_v45 = vpop.f32.mrb[2].mxu0  ;;  %v1804_v46 = vpop.f32.mrb[2].mxu1  ;;  %v963_v53 = vadd.f32 %v2032_v41, %v506_v43  ;;  %v995_v54 = vadd.f32 %v2032_v41, %v634_v44 }
  0xf8   :  { %v966_v49 = vadd.f32 %v1772_v45, %v2032_v41  ;;  %v998_v50 = vadd.f32 %v1804_v46, %v2032_v41  ;;  %v509_v51 = vpop.f32.mrb[3].mxu0  ;;  %v637_v52 = vpop.f32.mrb[3].mxu1 }
  0xf9   :  { %v964_v55 = vadd.f32 %v2032_v41, %v509_v51  ;;  %v996_v56 = vadd.f32 %v2032_v41, %v637_v52 }
  0xfa   :  { %v1530_v57 = vpack.c.bf16 %v966_v49, %v965_v47  ;;  %v1610_v58 = vpack.c.bf16 %v998_v50, %v997_v48 }
  0xfb   :  { %v1525_v59 = vpack.c.bf16 %v964_v55, %v963_v53  ;;  %v1605_v60 = vpack.c.bf16 %v996_v56, %v995_v54 }
  0xfc   :  { %1682 = vst [vmem:[%s2197_s3 + $0x8] sm:$0xff] %v1530_v57   ;;  %1698 = vst [vmem:[%s2197_s3 + $0x88] sm:$0xff] %v1610_v58  }
  0xfd   :  { %1526 = vst [vmem:[%s2197_s3] sm:$0xff] %v1525_v59   ;;  %1697 = vst [vmem:[%s2197_s3 + $0x80] sm:$0xff] %v1605_v60   ;;  %v1775_v61 = vpop.f32.mrb[4].mxu0  ;;  %v1807_v62 = vpop.f32.mrb[4].mxu1 }
  0xfe   :  { %v522_v63 = vpop.f32.mrb[5].mxu0  ;;  %v650_v0 = vpop.f32.mrb[5].mxu1  ;;  %v969_v3 = vadd.f32 %v1775_v61, %v2032_v41  ;;  %v1001_v4 = vadd.f32 %v1807_v62, %v2032_v41 }
  0xff   :  { %v1776_v1 = vpop.f32.mrb[6].mxu0  ;;  %v1808_v2 = vpop.f32.mrb[6].mxu1  ;;  %v967_v9 = vadd.f32 %v2032_v41, %v522_v63  ;;  %v999_v10 = vadd.f32 %v2032_v41, %v650_v0 }
 0x100   :  { %v970_v5 = vadd.f32 %v1776_v1, %v2032_v41  ;;  %v1002_v6 = vadd.f32 %v1808_v2, %v2032_v41  ;;  %v525_v7 = vpop.f32.mrb[7].mxu0  ;;  %v653_v8 = vpop.f32.mrb[7].mxu1 }
 0x101   :  { %v968_v11 = vadd.f32 %v2032_v41, %v525_v7  ;;  %v1000_v12 = vadd.f32 %v2032_v41, %v653_v8 }
 0x102   :  { %v1540_v13 = vpack.c.bf16 %v970_v5, %v969_v3  ;;  %v1620_v14 = vpack.c.bf16 %v1002_v6, %v1001_v4 }
 0x103   :  { %v1535_v15 = vpack.c.bf16 %v968_v11, %v967_v9  ;;  %v1615_v16 = vpack.c.bf16 %v1000_v12, %v999_v10 }
 0x104   :  { %1684 = vst [vmem:[%s2197_s3 + $0x18] sm:$0xff] %v1540_v13   ;;  %1700 = vst [vmem:[%s2197_s3 + $0x98] sm:$0xff] %v1620_v14  }
 0x105   :  { %1683 = vst [vmem:[%s2197_s3 + $0x10] sm:$0xff] %v1535_v15   ;;  %1699 = vst [vmem:[%s2197_s3 + $0x90] sm:$0xff] %v1615_v16   ;;  %v1779_v17 = vpop.f32.mrb[8].mxu0  ;;  %v1811_v18 = vpop.f32.mrb[8].mxu1 }
 0x106   :  { %v538_v19 = vpop.f32.mrb[9].mxu0  ;;  %v666_v20 = vpop.f32.mrb[9].mxu1  ;;  %v973_v23 = vadd.f32 %v1779_v17, %v2032_v41  ;;  %v1005_v24 = vadd.f32 %v1811_v18, %v2032_v41 }
 0x107   :  { %v1780_v21 = vpop.f32.mrb[10].mxu0  ;;  %v1812_v22 = vpop.f32.mrb[10].mxu1  ;;  %v971_v29 = vadd.f32 %v2032_v41, %v538_v19  ;;  %v1003_v30 = vadd.f32 %v2032_v41, %v666_v20 }
 0x108   :  { %v974_v25 = vadd.f32 %v1780_v21, %v2032_v41  ;;  %v1006_v26 = vadd.f32 %v1812_v22, %v2032_v41  ;;  %v541_v27 = vpop.f32.mrb[11].mxu0  ;;  %v669_v28 = vpop.f32.mrb[11].mxu1 }
 0x109   :  { %v972_v31 = vadd.f32 %v2032_v41, %v541_v27  ;;  %v1004_v32 = vadd.f32 %v2032_v41, %v669_v28 }
 0x10a   :  { %v1550_v33 = vpack.c.bf16 %v974_v25, %v973_v23  ;;  %v1630_v34 = vpack.c.bf16 %v1006_v26, %v1005_v24 }
 0x10b   :  { %v1545_v35 = vpack.c.bf16 %v972_v31, %v971_v29  ;;  %v1625_v36 = vpack.c.bf16 %v1004_v32, %v1003_v30 }
 0x10c   :  { %1686 = vst [vmem:[%s2197_s3 + $0x28] sm:$0xff] %v1550_v33   ;;  %1702 = vst [vmem:[%s2197_s3 + $0xa8] sm:$0xff] %v1630_v34  }
 0x10d   :  { %1685 = vst [vmem:[%s2197_s3 + $0x20] sm:$0xff] %v1545_v35   ;;  %1701 = vst [vmem:[%s2197_s3 + $0xa0] sm:$0xff] %v1625_v36   ;;  %v1783_v37 = vpop.f32.mrb[12].mxu0  ;;  %v1815_v38 = vpop.f32.mrb[12].mxu1 }
 0x10e   :  { %v554_v39 = vpop.f32.mrb[13].mxu0  ;;  %v682_v40 = vpop.f32.mrb[13].mxu1  ;;  %v977_v44 = vadd.f32 %v1783_v37, %v2032_v41  ;;  %v1009_v45 = vadd.f32 %v1815_v38, %v2032_v41 }
 0x10f   :  { %v1784_v42 = vpop.f32.mrb[14].mxu0  ;;  %v1816_v43 = vpop.f32.mrb[14].mxu1  ;;  %v975_v50 = vadd.f32 %v2032_v41, %v554_v39  ;;  %v1007_v51 = vadd.f32 %v2032_v41, %v682_v40 }
 0x110   :  { %v978_v46 = vadd.f32 %v1784_v42, %v2032_v41  ;;  %v1010_v47 = vadd.f32 %v1816_v43, %v2032_v41  ;;  %v557_v48 = vpop.f32.mrb[15].mxu0  ;;  %v685_v49 = vpop.f32.mrb[15].mxu1 }
 0x111   :  { %v976_v52 = vadd.f32 %v2032_v41, %v557_v48  ;;  %v1008_v53 = vadd.f32 %v2032_v41, %v685_v49 }
 0x112   :  { %v1560_v54 = vpack.c.bf16 %v978_v46, %v977_v44  ;;  %v1640_v55 = vpack.c.bf16 %v1010_v47, %v1009_v45 }
 0x113   :  { %v1555_v56 = vpack.c.bf16 %v976_v52, %v975_v50  ;;  %v1635_v57 = vpack.c.bf16 %v1008_v53, %v1007_v51 }
 0x114   :  { %1688 = vst [vmem:[%s2197_s3 + $0x38] sm:$0xff] %v1560_v54   ;;  %1704 = vst [vmem:[%s2197_s3 + $0xb8] sm:$0xff] %v1640_v55  }
 0x115   :  { %1687 = vst [vmem:[%s2197_s3 + $0x30] sm:$0xff] %v1555_v56   ;;  %1703 = vst [vmem:[%s2197_s3 + $0xb0] sm:$0xff] %v1635_v57   ;;  %v1787_v58 = vpop.f32.mrb[16].mxu0  ;;  %v1819_v59 = vpop.f32.mrb[16].mxu1 }
 0x116   :  { %v570_v60 = vpop.f32.mrb[17].mxu0  ;;  %v698_v61 = vpop.f32.mrb[17].mxu1  ;;  %v981_v0 = vadd.f32 %v1787_v58, %v2032_v41  ;;  %v1013_v1 = vadd.f32 %v1819_v59, %v2032_v41 }
 0x117   :  { %v1788_v62 = vpop.f32.mrb[18].mxu0  ;;  %v1820_v63 = vpop.f32.mrb[18].mxu1  ;;  %v979_v6 = vadd.f32 %v2032_v41, %v570_v60  ;;  %v1011_v7 = vadd.f32 %v2032_v41, %v698_v61 }
 0x118   :  { %v982_v2 = vadd.f32 %v1788_v62, %v2032_v41  ;;  %v1014_v3 = vadd.f32 %v1820_v63, %v2032_v41  ;;  %v573_v4 = vpop.f32.mrb[19].mxu0  ;;  %v701_v5 = vpop.f32.mrb[19].mxu1 }
 0x119   :  { %v980_v8 = vadd.f32 %v2032_v41, %v573_v4  ;;  %v1012_v9 = vadd.f32 %v2032_v41, %v701_v5 }
 0x11a   :  { %v1570_v10 = vpack.c.bf16 %v982_v2, %v981_v0  ;;  %v1650_v11 = vpack.c.bf16 %v1014_v3, %v1013_v1 }
 0x11b   :  { %v1565_v12 = vpack.c.bf16 %v980_v8, %v979_v6  ;;  %v1645_v13 = vpack.c.bf16 %v1012_v9, %v1011_v7 }
 0x11c   :  { %1690 = vst [vmem:[%s2197_s3 + $0x48] sm:$0xff] %v1570_v10   ;;  %1706 = vst [vmem:[%s2197_s3 + $0xc8] sm:$0xff] %v1650_v11  }
 0x11d   :  { %1689 = vst [vmem:[%s2197_s3 + $0x40] sm:$0xff] %v1565_v12   ;;  %1705 = vst [vmem:[%s2197_s3 + $0xc0] sm:$0xff] %v1645_v13   ;;  %v1791_v14 = vpop.f32.mrb[20].mxu0  ;;  %v1823_v15 = vpop.f32.mrb[20].mxu1 }
 0x11e   :  { %v586_v16 = vpop.f32.mrb[21].mxu0  ;;  %v714_v17 = vpop.f32.mrb[21].mxu1  ;;  %v985_v20 = vadd.f32 %v1791_v14, %v2032_v41  ;;  %v1017_v21 = vadd.f32 %v1823_v15, %v2032_v41 }
 0x11f   :  { %v1792_v18 = vpop.f32.mrb[22].mxu0  ;;  %v1824_v19 = vpop.f32.mrb[22].mxu1  ;;  %v983_v26 = vadd.f32 %v2032_v41, %v586_v16  ;;  %v1015_v27 = vadd.f32 %v2032_v41, %v714_v17 }
 0x120   :  { %v986_v22 = vadd.f32 %v1792_v18, %v2032_v41  ;;  %v1018_v23 = vadd.f32 %v1824_v19, %v2032_v41  ;;  %v589_v24 = vpop.f32.mrb[23].mxu0  ;;  %v717_v25 = vpop.f32.mrb[23].mxu1 }
 0x121   :  { %v984_v28 = vadd.f32 %v2032_v41, %v589_v24  ;;  %v1016_v29 = vadd.f32 %v2032_v41, %v717_v25 }
 0x122   :  { %v1580_v30 = vpack.c.bf16 %v986_v22, %v985_v20  ;;  %v1660_v31 = vpack.c.bf16 %v1018_v23, %v1017_v21 }
 0x123   :  { %v1575_v32 = vpack.c.bf16 %v984_v28, %v983_v26  ;;  %v1655_v33 = vpack.c.bf16 %v1016_v29, %v1015_v27 }
 0x124   :  { %1692 = vst [vmem:[%s2197_s3 + $0x58] sm:$0xff] %v1580_v30   ;;  %1708 = vst [vmem:[%s2197_s3 + $0xd8] sm:$0xff] %v1660_v31  }
 0x125   :  { %1691 = vst [vmem:[%s2197_s3 + $0x50] sm:$0xff] %v1575_v32   ;;  %1707 = vst [vmem:[%s2197_s3 + $0xd0] sm:$0xff] %v1655_v33   ;;  %v1795_v34 = vpop.f32.mrb[24].mxu0  ;;  %v1827_v35 = vpop.f32.mrb[24].mxu1 }
 0x126   :  { %v602_v36 = vpop.f32.mrb[25].mxu0  ;;  %v730_v37 = vpop.f32.mrb[25].mxu1  ;;  %v989_v40 = vadd.f32 %v1795_v34, %v2032_v41  ;;  %v1021_v42 = vadd.f32 %v1827_v35, %v2032_v41 }
 0x127   :  { %v1796_v38 = vpop.f32.mrb[26].mxu0  ;;  %v1828_v39 = vpop.f32.mrb[26].mxu1  ;;  %v987_v47 = vadd.f32 %v2032_v41, %v602_v36  ;;  %v1019_v48 = vadd.f32 %v2032_v41, %v730_v37 }
 0x128   :  { %v990_v43 = vadd.f32 %v1796_v38, %v2032_v41  ;;  %v1022_v44 = vadd.f32 %v1828_v39, %v2032_v41  ;;  %v605_v45 = vpop.f32.mrb[27].mxu0  ;;  %v733_v46 = vpop.f32.mrb[27].mxu1 }
 0x129   :  { %v988_v49 = vadd.f32 %v2032_v41, %v605_v45  ;;  %v1020_v50 = vadd.f32 %v2032_v41, %v733_v46 }
 0x12a   :  { %v1590_v51 = vpack.c.bf16 %v990_v43, %v989_v40  ;;  %v1670_v52 = vpack.c.bf16 %v1022_v44, %v1021_v42 }
 0x12b   :  { %v1585_v53 = vpack.c.bf16 %v988_v49, %v987_v47  ;;  %v1665_v54 = vpack.c.bf16 %v1020_v50, %v1019_v48 }
 0x12c   :  { %1694 = vst [vmem:[%s2197_s3 + $0x68] sm:$0xff] %v1590_v51   ;;  %1710 = vst [vmem:[%s2197_s3 + $0xe8] sm:$0xff] %v1670_v52  }
 0x12d   :  { %1693 = vst [vmem:[%s2197_s3 + $0x60] sm:$0xff] %v1585_v53   ;;  %1709 = vst [vmem:[%s2197_s3 + $0xe0] sm:$0xff] %v1665_v54   ;;  %v1799_v55 = vpop.f32.mrb[28].mxu0  ;;  %v1831_v56 = vpop.f32.mrb[28].mxu1 }
 0x12e   :  { %v618_v57 = vpop.f32.mrb[29].mxu0  ;;  %v746_v58 = vpop.f32.mrb[29].mxu1  ;;  %v993_v61 = vadd.f32 %v1799_v55, %v2032_v41  ;;  %v1025_v62 = vadd.f32 %v1831_v56, %v2032_v41 }
 0x12f   :  { %v1800_v59 = vpop.f32.mrb[30].mxu0  ;;  %v1832_v60 = vpop.f32.mrb[30].mxu1  ;;  %v991_v3 = vadd.f32 %v2032_v41, %v618_v57  ;;  %v1023_v4 = vadd.f32 %v2032_v41, %v746_v58 }
 0x130   :  { %v994_v63 = vadd.f32 %v1800_v59, %v2032_v41  ;;  %v1026_v0 = vadd.f32 %v1832_v60, %v2032_v41  ;;  %v621_v1 = vpop.f32.mrb[31].mxu0  ;;  %v749_v2 = vpop.f32.mrb[31].mxu1 }
 0x131   :  { %v992_v5 = vadd.f32 %v2032_v41, %v621_v1  ;;  %v1024_v6 = vadd.f32 %v2032_v41, %v749_v2 }
 0x132   :  { %v1600_v7 = vpack.c.bf16 %v994_v63, %v993_v61  ;;  %v1680_v8 = vpack.c.bf16 %v1026_v0, %v1025_v62 }
 0x133   :  { %v1595_v9 = vpack.c.bf16 %v992_v5, %v991_v3  ;;  %v1675_v10 = vpack.c.bf16 %v1024_v6, %v1023_v4 }
 0x134   :  { %1696 = vst [vmem:[%s2197_s3 + $0x78] sm:$0xff] %v1600_v7   ;;  %1712 = vst [vmem:[%s2197_s3 + $0xf8] sm:$0xff] %v1680_v8  }
 0x135   :  { %1695 = vst [vmem:[%s2197_s3 + $0x70] sm:$0xff] %v1595_v9   ;;  %1711 = vst [vmem:[%s2197_s3 + $0xf0] sm:$0xff] %v1675_v10  }

// kernel: _lambda_.10
= control target key start
LH: loop header
LB: loop body
LE: loop exit
PB: predicated region body
PF: predicated region fallthrough
CT: control target
= control target key end

     0   :  { %s455_s0 = inlined_call_operand.vmem [shape: bf16[128,128], index: 0, kind: input, shape index: {}]   ;;  %s456_s1 = inlined_call_operand.vmem [shape: f32[1,128], index: 1, kind: input, shape index: {}]   ;;  %s457_s2 = inlined_call_operand.vmem [shape: f32[1,128], index: 2, kind: input, shape index: {}]   ;;  %s458_s3 = inlined_call_operand.vmem [shape: bf16[128,128], index: 3, kind: output, shape index: {}]  }
   0x1   :  { %v259_v0 = vld [vmem:[%s455_s0] sm:$0xff]   ;;  %v330_v4 = vld [vmem:[%s455_s0 + $0x8] sm:$0xff]   ;;  %v331_v5 = vld [vmem:[%s455_s0 + $0x10] sm:$0xff]  }
   0x2   :  { %v370_v1 = vld [vmem:[%s456_s1] ss:$0 sm:$0xff]  ;;  %v260_v2 = vunpack.c.l.bf16 %v259_v0  ;;  %v261_v3 = vunpack.c.h.bf16 %v259_v0  ;;  %v332_v6 = vld [vmem:[%s455_s0 + $0x18] sm:$0xff]   ;;  %v264_v8 = vunpack.c.l.bf16 %v330_v4  ;;  %v265_v9 = vunpack.c.h.bf16 %v330_v4  ;;  %v334_v35 = vld [vmem:[%s455_s0 + $0x28] sm:$0xff]  }
   0x3   :  { %v384_v7 = vld [vmem:[%s457_s2] ss:$0 sm:$0xff]  ;;  %v268_v10 = vunpack.c.l.bf16 %v331_v5  ;;  %v269_v11 = vunpack.c.h.bf16 %v331_v5  ;;  %v272_v14 = vunpack.c.l.bf16 %v332_v6  ;;  %v273_v15 = vunpack.c.h.bf16 %v332_v6  ;;  %v335_v48 = vld [vmem:[%s455_s0 + $0x30] sm:$0xff]   ;;  %v336_v4 = vld [vmem:[%s455_s0 + $0x38] sm:$0xff]  }
   0x4   :  { %v53_v12 = vmul.f32 %v260_v2, %v370_v1  ;;  %v54_v13 = vmul.f32 %v261_v3, %v370_v1  ;;  %v55_v16 = vmul.f32 %v264_v8, %v370_v1  ;;  %v56_v17 = vmul.f32 %v265_v9, %v370_v1  ;;  %v333_v34 = vld [vmem:[%s455_s0 + $0x20] sm:$0xff]  }
   0x5   :  { %v57_v18 = vmul.f32 %v268_v10, %v370_v1  ;;  %v58_v19 = vmul.f32 %v269_v11, %v370_v1  ;;  %v59_v22 = vmul.f32 %v272_v14, %v370_v1  ;;  %v60_v23 = vmul.f32 %v273_v15, %v370_v1 }
   0x6   :  { %v76_v20 = vadd.f32 %v384_v7, %v53_v12  ;;  %v77_v21 = vadd.f32 %v384_v7, %v54_v13  ;;  %v78_v24 = vadd.f32 %v384_v7, %v55_v16  ;;  %v79_v25 = vadd.f32 %v384_v7, %v56_v17 }
   0x7   :  { %v80_v26 = vadd.f32 %v384_v7, %v57_v18  ;;  %v81_v27 = vadd.f32 %v384_v7, %v58_v19  ;;  %v82_v42 = vadd.f32 %v384_v7, %v59_v22  ;;  %v83_v43 = vadd.f32 %v384_v7, %v60_v23 }
   0x8   :  { %vm92_vm0 = vcmp.ge.f32.partialorder %v76_v20, 0.0  ;;  %vm93_vm1 = vcmp.ge.f32.partialorder %v77_v21, 0.0  ;;  %v108_v28 = vmul.f32 0.2, %v76_v20  ;;  %v109_v29 = vmul.f32 0.2, %v77_v21 }
   0x9   :  { %vm94_vm2 = vcmp.ge.f32.partialorder %v78_v24, 0.0  ;;  %vm95_vm3 = vcmp.ge.f32.partialorder %v79_v25, 0.0  ;;  %v110_v30 = vmul.f32 0.2, %v78_v24  ;;  %v111_v31 = vmul.f32 0.2, %v79_v25 }
   0xa   :  { %v124_v32 = vsel %vm92_vm0, %v76_v20, %v108_v28  ;;  %v125_v33 = vsel %vm93_vm1, %v77_v21, %v109_v29  ;;  %vm96_vm4 = vcmp.ge.f32.partialorder %v80_v26, 0.0  ;;  %vm97_vm5 = vcmp.ge.f32.partialorder %v81_v27, 0.0 }
   0xb   :  { %v293_v36 = vpack.c.bf16 %v125_v33, %v124_v32  ;;  %v126_v37 = vsel %vm94_vm2, %v78_v24, %v110_v30  ;;  %v127_v38 = vsel %vm95_vm3, %v79_v25, %v111_v31  ;;  %v112_v39 = vmul.f32 0.2, %v80_v26 }
   0xc   :  { %v298_v40 = vpack.c.bf16 %v127_v38, %v126_v37  ;;  %v113_v41 = vmul.f32 0.2, %v81_v27  ;;  %v276_v45 = vunpack.c.l.bf16 %v333_v34  ;;  %v277_v46 = vunpack.c.h.bf16 %v333_v34 }
   0xd   :  { %294 = vst [vmem:[%s458_s3] sm:$0xff] %v293_v36   ;;  %v128_v44 = vsel %vm96_vm4, %v80_v26, %v112_v39  ;;  %v280_v47 = vunpack.c.l.bf16 %v334_v35  ;;  %vm98_vm6 = vcmp.ge.f32.partialorder %v82_v42, 0.0  ;;  %vm99_vm7 = vcmp.ge.f32.partialorder %v83_v43, 0.0 }
   0xe   :  { %337 = vst [vmem:[%s458_s3 + $0x8] sm:$0xff] %v298_v40   ;;  %v129_v49 = vsel %vm97_vm5, %v81_v27, %v113_v41  ;;  %v114_v50 = vmul.f32 0.2, %v82_v42  ;;  %v115_v52 = vmul.f32 0.2, %v83_v43  ;;  %v61_v53 = vmul.f32 %v276_v45, %v370_v1 }
   0xf   :  { %v303_v51 = vpack.c.bf16 %v129_v49, %v128_v44  ;;  %v62_v54 = vmul.f32 %v277_v46, %v370_v1  ;;  %v281_v56 = vunpack.c.h.bf16 %v334_v35  ;;  %v63_v57 = vmul.f32 %v280_v47, %v370_v1 }
  0x10   :  { %v130_v55 = vsel %vm98_vm6, %v82_v42, %v114_v50  ;;  %v284_v58 = vunpack.c.l.bf16 %v335_v48  ;;  %v131_v59 = vsel %vm99_vm7, %v83_v43, %v115_v52  ;;  %v84_v60 = vadd.f32 %v384_v7, %v61_v53 }
  0x11   :  { %338 = vst [vmem:[%s458_s3 + $0x10] sm:$0xff] %v303_v51   ;;  %v85_v61 = vadd.f32 %v384_v7, %v62_v54  ;;  %v285_v62 = vunpack.c.h.bf16 %v335_v48  ;;  %v308_v63 = vpack.c.bf16 %v131_v59, %v130_v55  ;;  %v64_v0 = vmul.f32 %v281_v56, %v370_v1 }
  0x12   :  { %v86_v2 = vadd.f32 %v384_v7, %v63_v57  ;;  %v65_v3 = vmul.f32 %v284_v58, %v370_v1  ;;  %vm100_vm8 = vcmp.ge.f32.partialorder %v84_v60, 0.0  ;;  %v116_v5 = vmul.f32 0.2, %v84_v60 }
  0x13   :  { %vm101_vm9 = vcmp.ge.f32.partialorder %v85_v61, 0.0  ;;  %v117_v6 = vmul.f32 0.2, %v85_v61  ;;  %339 = vst [vmem:[%s458_s3 + $0x18] sm:$0xff] %v308_v63   ;;  %v87_v8 = vadd.f32 %v384_v7, %v64_v0  ;;  %v66_v10 = vmul.f32 %v285_v62, %v370_v1 }
  0x14   :  { %vm102_vm10 = vcmp.ge.f32.partialorder %v86_v2, 0.0  ;;  %v118_v9 = vmul.f32 0.2, %v86_v2  ;;  %v132_v11 = vsel %vm100_vm8, %v84_v60, %v116_v5  ;;  %v88_v13 = vadd.f32 %v384_v7, %v65_v3 }
  0x15   :  { %v133_v12 = vsel %vm101_vm9, %v85_v61, %v117_v6  ;;  %v288_v14 = vunpack.c.l.bf16 %v336_v4  ;;  %vm103_vm11 = vcmp.ge.f32.partialorder %v87_v8, 0.0  ;;  %v119_v16 = vmul.f32 0.2, %v87_v8 }
  0x16   :  { %v313_v15 = vpack.c.bf16 %v133_v12, %v132_v11  ;;  %v134_v17 = vsel %vm102_vm10, %v86_v2, %v118_v9  ;;  %v89_v18 = vadd.f32 %v384_v7, %v66_v10  ;;  %vm104_vm12 = vcmp.ge.f32.partialorder %v88_v13, 0.0 }
  0x17   :  { %v120_v19 = vmul.f32 0.2, %v88_v13  ;;  %v289_v20 = vunpack.c.h.bf16 %v336_v4  ;;  %v135_v21 = vsel %vm103_vm11, %v87_v8, %v119_v16  ;;  %v67_v22 = vmul.f32 %v288_v14, %v370_v1 }
  0x18   :  { %340 = vst [vmem:[%s458_s3 + $0x20] sm:$0xff] %v313_v15   ;;  %v318_v23 = vpack.c.bf16 %v135_v21, %v134_v17  ;;  %vm105_vm13 = vcmp.ge.f32.partialorder %v89_v18, 0.0  ;;  %v121_v24 = vmul.f32 0.2, %v89_v18 }
  0x19   :  { %v136_v25 = vsel %vm104_vm12, %v88_v13, %v120_v19  ;;  %v68_v26 = vmul.f32 %v289_v20, %v370_v1  ;;  %v90_v27 = vadd.f32 %v384_v7, %v67_v22 }
  0x1a   :  { %341 = vst [vmem:[%s458_s3 + $0x28] sm:$0xff] %v318_v23   ;;  %v137_v28 = vsel %vm105_vm13, %v89_v18, %v121_v24 }
  0x1b   :  { %v323_v29 = vpack.c.bf16 %v137_v28, %v136_v25  ;;  %v91_v30 = vadd.f32 %v384_v7, %v68_v26  ;;  %vm106_vm14 = vcmp.ge.f32.partialorder %v90_v27, 0.0  ;;  %v122_v31 = vmul.f32 0.2, %v90_v27 }
  0x1d   :  { %342 = vst [vmem:[%s458_s3 + $0x30] sm:$0xff] %v323_v29   ;;  %vm107_vm15 = vcmp.ge.f32.partialorder %v91_v30, 0.0  ;;  %v123_v32 = vmul.f32 0.2, %v91_v30  ;;  %v138_v33 = vsel %vm106_vm14, %v90_v27, %v122_v31 }
  0x1f   :  { %v139_v1 = vsel %vm107_vm15, %v91_v30, %v123_v32 }
  0x20   :  { %v328_v34 = vpack.c.bf16 %v139_v1, %v138_v33 }
  0x22   :  { %343 = vst [vmem:[%s458_s3 + $0x38] sm:$0xff] %v328_v34  }

// kernel: _lambda_.9
= control target key start
LH: loop header
LB: loop body
LE: loop exit
PB: predicated region body
PF: predicated region fallthrough
CT: control target
= control target key end

     0   :  { %s1884_s15 = smov 0   ;;  %s1886_s16 = smov 0   ;;  %s2117_s0 = inlined_call_operand.vmem [shape: bf16[128,2048], index: 0, kind: input, shape index: {}]   ;;  %s2118_s1 = inlined_call_operand.vmem [shape: bf16[2048,128], index: 1, kind: input, shape index: {}]   ;;  %s2119_s2 = inlined_call_operand.vmem [shape: bf16[128,128], index: 2, kind: output, shape index: {0}]   ;;  %s2120_s3 = inlined_call_operand.vmem [shape: f32[1,1,128], index: 3, kind: output, shape index: {1}]   ;;  %s2121_s4 = inlined_call_operand.vmem [shape: f32[1,1,128], index: 4, kind: output, shape index: {2}]  }
   0x1   :  { %s1888_s17 = smov 0   ;;  %s1890_s18 = smov 0  }
   0x2   :  { %s1892_s19 = smov 0  }
   0x3 LB: > { %s27_s20 = sadd.s32 1, %s1852_s18  ;;  %p50_p1 = scmp.ne.s32.totalorder %s1844_s16, %s1840_s15  ;;  %s1856_s19 = sphi %s1892_s19, %s15_s19   ;;  %s1852_s18 = sphi %s1890_s18, %s2125_s18   ;;  %s1848_s17 = sphi %s1888_s17, %s2124_s17   ;;  %s1844_s16 = sphi %s1886_s16, %s2123_s16   ;;  %s1840_s15 = sphi %s1884_s15, %s2122_s15  }
   0x4   : > { %p28_p0 = scmp.ge.s32.totalorder %s27_s20, 4  ;;  %p51_p2 = scmp.eq.s32.totalorder %s1856_s19, 0 }
   0x5   : > { %s43_s22 = sadd.s32 1, %s1844_s16  ;;  %p1409_p5 = scmp.ge.s32.totalorder %s1856_s19, 4 }
   0x6   : > { %s2127_s20 = smov (%p28_p0, %s27_s20), 0  ;;  %p52_p3 = por %p51_p2, %p50_p1 }
   0x7   : > { %s39_s21 = ssub.s32 %s1852_s18, %s2127_s20  ;;  %193 = sbr.rel (%p1409_p5) target bundleno = 34 (0x22), region = 20 }
   0x8   : > { %p41_p4 = scmp.eq.s32.totalorder %s39_s21, 0 }
   0xa   : > { %s1919_s23 = scalar_select %p41_p4, %s1844_s16, %s43_s22  }
   0xe   : > { %196 = sbr.rel (!%p52_p3) target bundleno = 34 (0x22), region = 24  ;;  %s198_s24 = sand.u32 (%p52_p3), 1, %s1844_s16  }
   0xf   : > { %s1505_s25 = sshll.u32 (%p52_p3), %s1852_s18, 4  ;;  %s1410_s26 = sshll.u32 (%p52_p3), %s198_s24, 8 }
  0x10   : > { %s1927_s29 = scalar_lea.vmem (%p52_p3), %s2117_s0, %s1505_s25  ;;  %s1932_s30 = scalar_lea.vmem (%p52_p3), [#allocation3], %s1410_s26 }
  0x11   : > { %v219_v0 = vld [vmem:[%s1927_s29] sm:$0xff] (%p52_p3)  ;;  %v221_v1 = vld [vmem:[%s1927_s29 + $0x8] sm:$0xff] (%p52_p3) }
  0x12   : > { %v223_v2 = vld [vmem:[%s1927_s29 + $0x40] sm:$0xff] (%p52_p3)  ;;  %220 = vst [vmem:[%s1932_s30] sm:$0xff] (%p52_p3), %v219_v0  ;;  %222 = vst [vmem:[%s1932_s30 + $0x8] sm:$0xff] (%p52_p3), %v221_v1  ;;  %v225_v3 = vld [vmem:[%s1927_s29 + $0x48] sm:$0xff] (%p52_p3) }
  0x13   : > { %224 = vst [vmem:[%s1932_s30 + $0x10] sm:$0xff] (%p52_p3), %v223_v2  ;;  %v227_v4 = vld [vmem:[%s1927_s29 + $0x80] sm:$0xff] (%p52_p3)  ;;  %v229_v5 = vld [vmem:[%s1927_s29 + $0x88] sm:$0xff] (%p52_p3)  ;;  %226 = vst [vmem:[%s1932_s30 + $0x18] sm:$0xff] (%p52_p3), %v225_v3 }
  0x14   : > { %228 = vst [vmem:[%s1932_s30 + $0x20] sm:$0xff] (%p52_p3), %v227_v4  ;;  %230 = vst [vmem:[%s1932_s30 + $0x28] sm:$0xff] (%p52_p3), %v229_v5  ;;  %v231_v6 = vld [vmem:[%s1927_s29 + $0xc0] sm:$0xff] (%p52_p3)  ;;  %v233_v7 = vld [vmem:[%s1927_s29 + $0xc8] sm:$0xff] (%p52_p3) }
  0x15   : > { %v235_v8 = vld [vmem:[%s1927_s29 + $0x100] sm:$0xff]  ;;  %232 = vst [vmem:[%s1932_s30 + $0x30] sm:$0xff] %v231_v6  ;;  %234 = vst [vmem:[%s1932_s30 + $0x38] sm:$0xff] %v233_v7  ;;  %v237_v9 = vld [vmem:[%s1927_s29 + $0x108] sm:$0xff] }
  0x16   : > { %236 = vst [vmem:[%s1932_s30 + $0x40] sm:$0xff] %v235_v8  ;;  %v239_v10 = vld [vmem:[%s1927_s29 + $0x140] sm:$0xff]  ;;  %v241_v11 = vld [vmem:[%s1927_s29 + $0x148] sm:$0xff]  ;;  %238 = vst [vmem:[%s1932_s30 + $0x48] sm:$0xff] %v237_v9 }
  0x17   : > { %240 = vst [vmem:[%s1932_s30 + $0x50] sm:$0xff] %v239_v10  ;;  %242 = vst [vmem:[%s1932_s30 + $0x58] sm:$0xff] %v241_v11  ;;  %v243_v12 = vld [vmem:[%s1927_s29 + $0x180] sm:$0xff]  ;;  %v245_v13 = vld [vmem:[%s1927_s29 + $0x188] sm:$0xff] }
  0x18   : > { %v247_v14 = vld [vmem:[%s1927_s29 + $0x1c0] sm:$0xff]  ;;  %244 = vst [vmem:[%s1932_s30 + $0x60] sm:$0xff] %v243_v12  ;;  %246 = vst [vmem:[%s1932_s30 + $0x68] sm:$0xff] %v245_v13  ;;  %v249_v15 = vld [vmem:[%s1927_s29 + $0x1c8] sm:$0xff] }
  0x19   : > { %248 = vst [vmem:[%s1932_s30 + $0x70] sm:$0xff] %v247_v14  ;;  %v251_v16 = vld [vmem:[%s1927_s29 + $0x200] sm:$0xff]  ;;  %v253_v17 = vld [vmem:[%s1927_s29 + $0x208] sm:$0xff]  ;;  %250 = vst [vmem:[%s1932_s30 + $0x78] sm:$0xff] %v249_v15 }
  0x1a   : > { %252 = vst [vmem:[%s1932_s30 + $0x80] sm:$0xff] %v251_v16  ;;  %254 = vst [vmem:[%s1932_s30 + $0x88] sm:$0xff] %v253_v17  ;;  %v255_v18 = vld [vmem:[%s1927_s29 + $0x240] sm:$0xff]  ;;  %v257_v19 = vld [vmem:[%s1927_s29 + $0x248] sm:$0xff] }
  0x1b   : > { %v259_v20 = vld [vmem:[%s1927_s29 + $0x280] sm:$0xff]  ;;  %256 = vst [vmem:[%s1932_s30 + $0x90] sm:$0xff] %v255_v18  ;;  %258 = vst [vmem:[%s1932_s30 + $0x98] sm:$0xff] %v257_v19  ;;  %v261_v21 = vld [vmem:[%s1927_s29 + $0x288] sm:$0xff] }
  0x1c   : > { %260 = vst [vmem:[%s1932_s30 + $0xa0] sm:$0xff] %v259_v20  ;;  %v263_v22 = vld [vmem:[%s1927_s29 + $0x2c0] sm:$0xff]  ;;  %v265_v23 = vld [vmem:[%s1927_s29 + $0x2c8] sm:$0xff]  ;;  %262 = vst [vmem:[%s1932_s30 + $0xa8] sm:$0xff] %v261_v21 }
  0x1d   : > { %264 = vst [vmem:[%s1932_s30 + $0xb0] sm:$0xff] %v263_v22  ;;  %266 = vst [vmem:[%s1932_s30 + $0xb8] sm:$0xff] %v265_v23  ;;  %v267_v24 = vld [vmem:[%s1927_s29 + $0x300] sm:$0xff]  ;;  %v269_v25 = vld [vmem:[%s1927_s29 + $0x308] sm:$0xff] }
  0x1e   : > { %v271_v26 = vld [vmem:[%s1927_s29 + $0x340] sm:$0xff]  ;;  %268 = vst [vmem:[%s1932_s30 + $0xc0] sm:$0xff] %v267_v24  ;;  %270 = vst [vmem:[%s1932_s30 + $0xc8] sm:$0xff] %v269_v25  ;;  %v273_v27 = vld [vmem:[%s1927_s29 + $0x348] sm:$0xff] }
  0x1f   : > { %272 = vst [vmem:[%s1932_s30 + $0xd0] sm:$0xff] %v271_v26  ;;  %v275_v28 = vld [vmem:[%s1927_s29 + $0x380] sm:$0xff]  ;;  %v277_v29 = vld [vmem:[%s1927_s29 + $0x388] sm:$0xff]  ;;  %274 = vst [vmem:[%s1932_s30 + $0xd8] sm:$0xff] %v273_v27 }
  0x20   : > { %276 = vst [vmem:[%s1932_s30 + $0xe0] sm:$0xff] %v275_v28  ;;  %278 = vst [vmem:[%s1932_s30 + $0xe8] sm:$0xff] %v277_v29  ;;  %v279_v30 = vld [vmem:[%s1927_s29 + $0x3c0] sm:$0xff]  ;;  %v281_v31 = vld [vmem:[%s1927_s29 + $0x3c8] sm:$0xff] }
  0x21   : > { %280 = vst [vmem:[%s1932_s30 + $0xf0] sm:$0xff] %v279_v30  ;;  %282 = vst [vmem:[%s1932_s30 + $0xf8] sm:$0xff] %v281_v31 }
  0x22 PF: > { %p1413_p6 = scmp.ge.s32.totalorder %s1856_s19, 1  ;;  %p287_p7 = scmp.lt.s32.totalorder %s1856_s19, 5 }
  0x24   : > { %p288_p8 = pnand %p1413_p6, %p287_p7 }
  0x25   : > { %s294_s5 = sand.u32 (!%p288_p8), 1, %s1840_s15   ;;  %p1415_p9 = scmp.ne.s32.totalorder (!%p288_p8), %s1848_s17, 0 }
  0x26   : > { %291 = sbr.rel (%p288_p8) target bundleno = 395 (0x18b), region = 47  ;;  %s1414_s6 = sshll.u32 (!%p288_p8), %s294_s5, 8 }
  0x27   : > { %s1998_s7 = scalar_lea.vmem (!%p288_p8), [#allocation3], %s1414_s6 }
  0x2d   : > { %369 = sbr.rel (%p1415_p9) target bundleno = 54 (0x36), region = 55  ;;  %v1858_v32 = vmov (!%p1415_p9), 0.0  }
  0x2e   : > { %370 = vst [vmem:[#allocation2] sm:$0xff] (!%p1415_p9), %v1858_v32  ;;  %371 = vst [vmem:[#allocation2 + $0x8] sm:$0xff] (!%p1415_p9), %v1858_v32 }
  0x2f   : > { %372 = vst [vmem:[#allocation2 + $0x10] sm:$0xff] (!%p1415_p9), %v1858_v32  ;;  %373 = vst [vmem:[#allocation2 + $0x18] sm:$0xff] (!%p1415_p9), %v1858_v32 }
  0x30   : > { %374 = vst [vmem:[#allocation2 + $0x20] sm:$0xff] (!%p1415_p9), %v1858_v32  ;;  %375 = vst [vmem:[#allocation2 + $0x28] sm:$0xff] (!%p1415_p9), %v1858_v32 }
  0x31   : > { %376 = vst [vmem:[#allocation2 + $0x30] sm:$0xff] (!%p1415_p9), %v1858_v32  ;;  %377 = vst [vmem:[#allocation2 + $0x38] sm:$0xff] (!%p1415_p9), %v1858_v32 }
  0x32   : > { %378 = vst [vmem:[#allocation2 + $0x40] sm:$0xff] (!%p1415_p9), %v1858_v32  ;;  %379 = vst [vmem:[#allocation2 + $0x48] sm:$0xff] (!%p1415_p9), %v1858_v32 }
  0x33   : > { %380 = vst [vmem:[#allocation2 + $0x50] sm:$0xff] (!%p1415_p9), %v1858_v32  ;;  %381 = vst [vmem:[#allocation2 + $0x58] sm:$0xff] (!%p1415_p9), %v1858_v32 }
  0x34   : > { %382 = vst [vmem:[#allocation2 + $0x60] sm:$0xff] %v1858_v32  ;;  %383 = vst [vmem:[#allocation2 + $0x68] sm:$0xff] %v1858_v32 }
  0x35   : > { %384 = vst [vmem:[#allocation2 + $0x70] sm:$0xff] %v1858_v32  ;;  %385 = vst [vmem:[#allocation2 + $0x78] sm:$0xff] %v1858_v32 }
  0x36 PF: > { %s1416_s8 = sshll.u32 %s1848_s17, 9  ;;  %v1772_v33 = vld [vmem:[%s1998_s7 + $0x4] ss:$16 sps:$4 sm:$0xff]   ;;  %v1775_v34 = vld [vmem:[%s1998_s7 + $0xc] ss:$16 sps:$4 sm:$0xff]   ;;  %p1482_p10 = scmp.ne.s32.totalorder %s1848_s17, 3 }
  0x37   : > { %s435_s9 = sshra.s32 %s1416_s8, 3  ;;  %887 = vmatprep.mubr.bf16.mxu0 %v1772_v33  ;;  %984 = vmatprep.mubr.bf16.mxu1 %v1775_v34  ;;  %v1770_v1 = vld [vmem:[%s1998_s7] ss:$16 sps:$4 sm:$0xff]   ;;  %v1773_v4 = vld [vmem:[%s1998_s7 + $0x8] ss:$16 sps:$4 sm:$0xff]  }
  0x38   : > { %s1417_s10 = sshll.u32 %s435_s9, 2  ;;  %v1776_v5 = vld [vmem:[%s1998_s7 + $0x24] ss:$16 sps:$4 sm:$0xff]   ;;  %v1778_v6 = vld [vmem:[%s1998_s7 + $0x2c] ss:$16 sps:$4 sm:$0xff]  }
  0x39   : > { %s2007_s13 = scalar_lea.vmem %s2118_s1, %s1417_s10  ;;  %v1780_v7 = vld [vmem:[%s1998_s7 + $0x20] ss:$16 sps:$4 sm:$0xff]   ;;  %v1781_v8 = vld [vmem:[%s1998_s7 + $0x28] ss:$16 sps:$4 sm:$0xff]   ;;  %v1782_v9 = vld [vmem:[%s1998_s7 + $0x44] ss:$16 sps:$4 sm:$0xff]  }
  0x3a   : > { %v1738_v35 = vld [vmem:[%s2007_s13 + $0x40] sm:$0xff]   ;;  %v1742_v39 = vld [vmem:[%s2007_s13 + $0x48] sm:$0xff]   ;;  %v1746_v43 = vld [vmem:[%s2007_s13 + $0x50] sm:$0xff]  }
  0x3b   : > { %v1739_v36 = vld [vmem:[%s2007_s13 + $0xc0] sm:$0xff]   ;;  %1569 = vmatprep.subr.bf16.mxu0 %v1738_v35  ;;  %v1743_v40 = vld [vmem:[%s2007_s13 + $0xc8] sm:$0xff]   ;;  %v1747_v44 = vld [vmem:[%s2007_s13 + $0xd0] sm:$0xff]  }
  0x3c   : > { %v1740_v37 = vld [vmem:[%s2007_s13] sm:$0xff]   ;;  %1633 = vmatprep.subr.bf16.mxu1 %v1739_v36  ;;  %v1744_v41 = vld [vmem:[%s2007_s13 + $0x8] sm:$0xff]   ;;  %v1748_v45 = vld [vmem:[%s2007_s13 + $0x10] sm:$0xff]  }
  0x3d   : > { %v1741_v38 = vld [vmem:[%s2007_s13 + $0x80] sm:$0xff]   ;;  %1570 = vmatpush3.bf16.msra.mxu0 %v1740_v37  ;;  %v1745_v42 = vld [vmem:[%s2007_s13 + $0x88] sm:$0xff]   ;;  %v1749_v46 = vld [vmem:[%s2007_s13 + $0x90] sm:$0xff]  }
  0x3e   : > { %1634 = vmatpush3.bf16.msra.mxu1 %v1741_v38  ;;  %1571 = vmatprep.subr.bf16.mxu0 %v1742_v39  ;;  %v1750_v47 = vld [vmem:[%s2007_s13 + $0x58] sm:$0xff]   ;;  %v1754_v51 = vld [vmem:[%s2007_s13 + $0x60] sm:$0xff]   ;;  %v1758_v55 = vld [vmem:[%s2007_s13 + $0x68] sm:$0xff]  }
  0x3f   : > { %1635 = vmatprep.subr.bf16.mxu1 %v1743_v40  ;;  %v1751_v48 = vld [vmem:[%s2007_s13 + $0xd8] sm:$0xff]   ;;  %v1755_v52 = vld [vmem:[%s2007_s13 + $0xe0] sm:$0xff]   ;;  %v1759_v56 = vld [vmem:[%s2007_s13 + $0xe8] sm:$0xff]  }
  0x40   : > { %v1752_v49 = vld [vmem:[%s2007_s13 + $0x18] sm:$0xff]   ;;  %v1756_v53 = vld [vmem:[%s2007_s13 + $0x20] sm:$0xff]   ;;  %v1760_v57 = vld [vmem:[%s2007_s13 + $0x28] sm:$0xff]  }
  0x41   : > { %1572 = vmatpush3.bf16.msra.mxu0 %v1744_v41  ;;  %v1753_v50 = vld [vmem:[%s2007_s13 + $0x98] sm:$0xff]   ;;  %v1757_v54 = vld [vmem:[%s2007_s13 + $0xa0] sm:$0xff]   ;;  %v1761_v58 = vld [vmem:[%s2007_s13 + $0xa8] sm:$0xff]  }
  0x42   : > { %1636 = vmatpush3.bf16.msra.mxu1 %v1745_v42  ;;  %1573 = vmatprep.subr.bf16.mxu0 %v1746_v43  ;;  %v1762_v59 = vld [vmem:[%s2007_s13 + $0x70] sm:$0xff]   ;;  %v1766_v63 = vld [vmem:[%s2007_s13 + $0x78] sm:$0xff]   ;;  %v387_v42 = vld [vmem:[#allocation2] sm:$0xff] }
  0x43   : > { %1637 = vmatprep.subr.bf16.mxu1 %v1747_v44  ;;  %v1763_v60 = vld [vmem:[%s2007_s13 + $0xf0] sm:$0xff]   ;;  %v1767_v0 = vld [vmem:[%s2007_s13 + $0xf8] sm:$0xff]  }
  0x44   : > { %v1764_v61 = vld [vmem:[%s2007_s13 + $0x30] sm:$0xff]   ;;  %v1768_v2 = vld [vmem:[%s2007_s13 + $0x38] sm:$0xff]  }
  0x45   : > { %1574 = vmatpush3.bf16.msra.mxu0 %v1748_v45  ;;  %v1765_v62 = vld [vmem:[%s2007_s13 + $0xb0] sm:$0xff]   ;;  %v1769_v3 = vld [vmem:[%s2007_s13 + $0xb8] sm:$0xff]  }
  0x46   : > { %1638 = vmatpush3.bf16.msra.mxu1 %v1749_v46  ;;  %1575 = vmatprep.subr.bf16.mxu0 %v1750_v47  ;;  %v1784_v10 = vld [vmem:[%s1998_s7 + $0x4c] ss:$16 sps:$4 sm:$0xff]   ;;  %v1786_v11 = vld [vmem:[%s1998_s7 + $0x40] ss:$16 sps:$4 sm:$0xff]   ;;  %v1787_v12 = vld [vmem:[%s1998_s7 + $0x48] ss:$16 sps:$4 sm:$0xff]  }
  0x47   : > { %1639 = vmatprep.subr.bf16.mxu1 %v1751_v48  ;;  %v1788_v13 = vld [vmem:[%s1998_s7 + $0x64] ss:$16 sps:$4 sm:$0xff]   ;;  %v1790_v14 = vld [vmem:[%s1998_s7 + $0x6c] ss:$16 sps:$4 sm:$0xff]   ;;  %v1792_v15 = vld [vmem:[%s1998_s7 + $0x60] ss:$16 sps:$4 sm:$0xff]  }
  0x48   : > { %v1793_v16 = vld [vmem:[%s1998_s7 + $0x68] ss:$16 sps:$4 sm:$0xff]   ;;  %v1794_v17 = vld [vmem:[%s1998_s7 + $0x84] ss:$16 sps:$4 sm:$0xff]   ;;  %v1796_v18 = vld [vmem:[%s1998_s7 + $0x8c] ss:$16 sps:$4 sm:$0xff]  }
  0x49   : > { %1576 = vmatpush3.bf16.msra.mxu0 %v1752_v49  ;;  %v1798_v19 = vld [vmem:[%s1998_s7 + $0x80] ss:$16 sps:$4 sm:$0xff]   ;;  %v1799_v20 = vld [vmem:[%s1998_s7 + $0x88] ss:$16 sps:$4 sm:$0xff]   ;;  %v1800_v21 = vld [vmem:[%s1998_s7 + $0xa4] ss:$16 sps:$4 sm:$0xff]  }
  0x4a   : > { %1640 = vmatpush3.bf16.msra.mxu1 %v1753_v50  ;;  %1577 = vmatprep.subr.bf16.mxu0 %v1754_v51  ;;  %v1802_v22 = vld [vmem:[%s1998_s7 + $0xac] ss:$16 sps:$4 sm:$0xff]   ;;  %v1804_v23 = vld [vmem:[%s1998_s7 + $0xa0] ss:$16 sps:$4 sm:$0xff]   ;;  %v1805_v24 = vld [vmem:[%s1998_s7 + $0xa8] ss:$16 sps:$4 sm:$0xff]  }
  0x4b   : > { %1641 = vmatprep.subr.bf16.mxu1 %v1755_v52  ;;  %v1806_v25 = vld [vmem:[%s1998_s7 + $0xc4] ss:$16 sps:$4 sm:$0xff]   ;;  %v1808_v26 = vld [vmem:[%s1998_s7 + $0xcc] ss:$16 sps:$4 sm:$0xff]   ;;  %v1810_v27 = vld [vmem:[%s1998_s7 + $0xc0] ss:$16 sps:$4 sm:$0xff]  }
  0x4c   : > { %v1811_v28 = vld [vmem:[%s1998_s7 + $0xc8] ss:$16 sps:$4 sm:$0xff]   ;;  %v1812_v29 = vld [vmem:[%s1998_s7 + $0xe4] ss:$16 sps:$4 sm:$0xff]   ;;  %v1814_v30 = vld [vmem:[%s1998_s7 + $0xec] ss:$16 sps:$4 sm:$0xff]  }
  0x4d   : > { %1578 = vmatpush3.bf16.msra.mxu0 %v1756_v53  ;;  %v1816_v31 = vld [vmem:[%s1998_s7 + $0xe0] ss:$16 sps:$4 sm:$0xff]   ;;  %v1817_v32 = vld [vmem:[%s1998_s7 + $0xe8] ss:$16 sps:$4 sm:$0xff]  }
  0x4e   : > { %1642 = vmatpush3.bf16.msra.mxu1 %v1757_v54  ;;  %1579 = vmatprep.subr.bf16.mxu0 %v1758_v55  ;;  %v388_v47 = vld [vmem:[#allocation2 + $0x8] sm:$0xff] }
  0x4f   : > { %1643 = vmatprep.subr.bf16.mxu1 %v1759_v56 }
  0x51   : > { %1580 = vmatpush3.bf16.msra.mxu0 %v1760_v57 }
  0x52   : > { %1644 = vmatpush3.bf16.msra.mxu1 %v1761_v58  ;;  %1581 = vmatprep.subr.bf16.mxu0 %v1762_v59 }
  0x53   : > { %1645 = vmatprep.subr.bf16.mxu1 %v1763_v60  ;;  %v389_v60 = vld [vmem:[#allocation2 + $0x10] sm:$0xff] }
  0x55   : > { %1582 = vmatpush3.bf16.msra.mxu0 %v1764_v61 }
  0x56   : > { %1646 = vmatpush3.bf16.msra.mxu1 %v1765_v62  ;;  %1583 = vmatprep.subr.bf16.mxu0 %v1766_v63 }
  0x57   : > { %1647 = vmatprep.subr.bf16.mxu1 %v1767_v0 }
  0x59   : > { %1584 = vmatpush3.bf16.msra.mxu0 %v1768_v2 }
  0x5a   : > { %1648 = vmatpush3.bf16.msra.mxu1 %v1769_v3 }
  0x5c   : > { %888 = vmatmul.mubr.bf16.vlgmr.msra.gmra.mrb[0].mxu0 %v1770_v1  ;;  %v390_v1 = vld [vmem:[#allocation2 + $0x18] sm:$0xff] }
  0x5d   : > { %985 = vmatmul.mubr.bf16.vlgmr.msra.gmra.mrb[0].mxu1 %v1773_v4  ;;  %895 = vmatprep.mubr.bf16.mxu0 %v1776_v5 }
  0x5e   : > { %992 = vmatprep.mubr.bf16.mxu1 %v1778_v6 }
  0x64   : > { %896 = vmatmul.mubr.bf16.gmra.mrb[4].mxu0 %v1780_v7 }
  0x65   : > { %993 = vmatmul.mubr.bf16.gmra.mrb[4].mxu1 %v1781_v8  ;;  %903 = vmatprep.mubr.bf16.mxu0 %v1782_v9 }
  0x66   : > { %1000 = vmatprep.mubr.bf16.mxu1 %v1784_v10 }
  0x6c   : > { %904 = vmatmul.mubr.bf16.gmra.mrb[8].mxu0 %v1786_v11 }
  0x6d   : > { %1001 = vmatmul.mubr.bf16.gmra.mrb[8].mxu1 %v1787_v12  ;;  %911 = vmatprep.mubr.bf16.mxu0 %v1788_v13 }
  0x6e   : > { %1008 = vmatprep.mubr.bf16.mxu1 %v1790_v14  ;;  %v391_v14 = vld [vmem:[#allocation2 + $0x20] sm:$0xff] }
  0x74   : > { %912 = vmatmul.mubr.bf16.gmra.mrb[12].mxu0 %v1792_v15 }
  0x75   : > { %1009 = vmatmul.mubr.bf16.gmra.mrb[12].mxu1 %v1793_v16  ;;  %919 = vmatprep.mubr.bf16.mxu0 %v1794_v17 }
  0x76   : > { %1016 = vmatprep.mubr.bf16.mxu1 %v1796_v18 }
  0x7c   : > { %920 = vmatmul.mubr.bf16.gmra.mrb[16].mxu0 %v1798_v19  ;;  %v392_v19 = vld [vmem:[#allocation2 + $0x28] sm:$0xff] }
  0x7d   : > { %1017 = vmatmul.mubr.bf16.gmra.mrb[16].mxu1 %v1799_v20  ;;  %927 = vmatprep.mubr.bf16.mxu0 %v1800_v21 }
  0x7e   : > { %1024 = vmatprep.mubr.bf16.mxu1 %v1802_v22 }
  0x84   : > { %928 = vmatmul.mubr.bf16.gmra.mrb[20].mxu0 %v1804_v23 }
  0x85   : > { %1025 = vmatmul.mubr.bf16.gmra.mrb[20].mxu1 %v1805_v24  ;;  %935 = vmatprep.mubr.bf16.mxu0 %v1806_v25 }
  0x86   : > { %1032 = vmatprep.mubr.bf16.mxu1 %v1808_v26 }
  0x8c   : > { %936 = vmatmul.mubr.bf16.gmra.mrb[24].mxu0 %v1810_v27 }
  0x8d   : > { %1033 = vmatmul.mubr.bf16.gmra.mrb[24].mxu1 %v1811_v28  ;;  %943 = vmatprep.mubr.bf16.mxu0 %v1812_v29 }
  0x8e   : > { %1040 = vmatprep.mubr.bf16.mxu1 %v1814_v30 }
  0x94   : > { %944 = vmatmul.mubr.bf16.gmra.mrb[28].mxu0 %v1816_v31 }
  0x95   : > { %1041 = vmatmul.mubr.bf16.gmra.mrb[28].mxu1 %v1817_v32  ;;  %v393_v32 = vld [vmem:[#allocation2 + $0x30] sm:$0xff] }
 0x12f   : > { %v1585_v33 = vpop.f32.mrb[0].mxu0 }
 0x130   : > { %v1649_v34 = vpop.f32.mrb[0].mxu1  ;;  %v1586_v35 = vpop.f32.mrb[1].mxu0 }
 0x131   : > { %v1587_v36 = vadd.f32 %v1586_v35, %v1585_v33  ;;  %v1650_v37 = vpop.f32.mrb[1].mxu1  ;;  %v1588_v38 = vpop.f32.mrb[2].mxu0 }
 0x132   : > { %v1651_v39 = vadd.f32 %v1650_v37, %v1649_v34  ;;  %v1652_v40 = vpop.f32.mrb[2].mxu1  ;;  %v1589_v41 = vpop.f32.mrb[3].mxu0  ;;  %v394_v37 = vld [vmem:[#allocation2 + $0x38] sm:$0xff] }
 0x133   : > { %v1590_v43 = vadd.f32 %v1589_v41, %v1588_v38  ;;  %v1653_v44 = vpop.f32.mrb[3].mxu1 }
 0x134   : > { %v987_v45 = vadd.f32 %v1651_v39, %v1587_v36  ;;  %v1654_v46 = vadd.f32 %v1653_v44, %v1652_v40 }
 0x136   : > { %v1049_v48 = vadd.f32 %v987_v45, %v387_v42  ;;  %v990_v49 = vadd.f32 %v1654_v46, %v1590_v43 }
 0x137   : > { %v1591_v50 = vpop.f32.mrb[4].mxu0 }
 0x138   : > { %1065 = vst [vmem:[#allocation2] sm:$0xff] %v1049_v48  ;;  %v1050_v51 = vadd.f32 %v990_v49, %v388_v47  ;;  %v1655_v52 = vpop.f32.mrb[4].mxu1  ;;  %v1592_v53 = vpop.f32.mrb[5].mxu0 }
 0x139   : > { %v1593_v54 = vadd.f32 %v1592_v53, %v1591_v50  ;;  %v1656_v55 = vpop.f32.mrb[5].mxu1  ;;  %v1594_v56 = vpop.f32.mrb[6].mxu0  ;;  %v395_v50 = vld [vmem:[#allocation2 + $0x40] sm:$0xff] }
 0x13a   : > { %1066 = vst [vmem:[#allocation2 + $0x8] sm:$0xff] %v1050_v51  ;;  %v1657_v57 = vadd.f32 %v1656_v55, %v1655_v52  ;;  %v1658_v58 = vpop.f32.mrb[6].mxu1  ;;  %v1595_v59 = vpop.f32.mrb[7].mxu0  ;;  %v396_v55 = vld [vmem:[#allocation2 + $0x48] sm:$0xff] }
 0x13b   : > { %v1596_v61 = vadd.f32 %v1595_v59, %v1594_v56  ;;  %v1659_v62 = vpop.f32.mrb[7].mxu1 }
 0x13c   : > { %v995_v63 = vadd.f32 %v1657_v57, %v1593_v54  ;;  %v1660_v0 = vadd.f32 %v1659_v62, %v1658_v58 }
 0x13e   : > { %v1051_v2 = vadd.f32 %v995_v63, %v389_v60  ;;  %v998_v3 = vadd.f32 %v1660_v0, %v1596_v61 }
 0x13f   : > { %v1597_v4 = vpop.f32.mrb[8].mxu0 }
 0x140   : > { %1067 = vst [vmem:[#allocation2 + $0x10] sm:$0xff] %v1051_v2  ;;  %v1052_v5 = vadd.f32 %v998_v3, %v390_v1  ;;  %v1661_v6 = vpop.f32.mrb[8].mxu1  ;;  %v1598_v7 = vpop.f32.mrb[9].mxu0 }
 0x141   : > { %v1599_v8 = vadd.f32 %v1598_v7, %v1597_v4  ;;  %v1662_v9 = vpop.f32.mrb[9].mxu1  ;;  %v1600_v10 = vpop.f32.mrb[10].mxu0  ;;  %v397_v4 = vld [vmem:[#allocation2 + $0x50] sm:$0xff] }
 0x142   : > { %1068 = vst [vmem:[#allocation2 + $0x18] sm:$0xff] %v1052_v5  ;;  %v1663_v11 = vadd.f32 %v1662_v9, %v1661_v6  ;;  %v1664_v12 = vpop.f32.mrb[10].mxu1  ;;  %v1601_v13 = vpop.f32.mrb[11].mxu0  ;;  %v398_v9 = vld [vmem:[#allocation2 + $0x58] sm:$0xff] }
 0x143   : > { %v1602_v15 = vadd.f32 %v1601_v13, %v1600_v10  ;;  %v1665_v16 = vpop.f32.mrb[11].mxu1 }
 0x144   : > { %v1003_v17 = vadd.f32 %v1663_v11, %v1599_v8  ;;  %v1666_v18 = vadd.f32 %v1665_v16, %v1664_v12 }
 0x146   : > { %v1053_v20 = vadd.f32 %v1003_v17, %v391_v14  ;;  %v1006_v21 = vadd.f32 %v1666_v18, %v1602_v15 }
 0x147   : > { %v1603_v22 = vpop.f32.mrb[12].mxu0 }
 0x148   : > { %1069 = vst [vmem:[#allocation2 + $0x20] sm:$0xff] %v1053_v20  ;;  %v1054_v23 = vadd.f32 %v1006_v21, %v392_v19  ;;  %v1667_v24 = vpop.f32.mrb[12].mxu1  ;;  %v1604_v25 = vpop.f32.mrb[13].mxu0 }
 0x149   : > { %v1605_v26 = vadd.f32 %v1604_v25, %v1603_v22  ;;  %v1668_v27 = vpop.f32.mrb[13].mxu1  ;;  %v1606_v28 = vpop.f32.mrb[14].mxu0  ;;  %v399_v22 = vld [vmem:[#allocation2 + $0x60] sm:$0xff] }
 0x14a   : > { %1070 = vst [vmem:[#allocation2 + $0x28] sm:$0xff] %v1054_v23  ;;  %v1669_v29 = vadd.f32 %v1668_v27, %v1667_v24  ;;  %v1670_v30 = vpop.f32.mrb[14].mxu1  ;;  %v1607_v31 = vpop.f32.mrb[15].mxu0  ;;  %v400_v27 = vld [vmem:[#allocation2 + $0x68] sm:$0xff] }
 0x14b   : > { %v1608_v33 = vadd.f32 %v1607_v31, %v1606_v28  ;;  %v1671_v34 = vpop.f32.mrb[15].mxu1 }
 0x14c   : > { %v1011_v35 = vadd.f32 %v1669_v29, %v1605_v26  ;;  %v1672_v36 = vadd.f32 %v1671_v34, %v1670_v30 }
 0x14e   : > { %v1055_v38 = vadd.f32 %v1011_v35, %v393_v32  ;;  %v1014_v39 = vadd.f32 %v1672_v36, %v1608_v33 }
 0x14f   : > { %v1609_v40 = vpop.f32.mrb[16].mxu0 }
 0x150   : > { %1071 = vst [vmem:[#allocation2 + $0x30] sm:$0xff] %v1055_v38  ;;  %v1056_v41 = vadd.f32 %v1014_v39, %v394_v37  ;;  %v1673_v42 = vpop.f32.mrb[16].mxu1  ;;  %v1610_v43 = vpop.f32.mrb[17].mxu0 }
 0x151   : > { %v1611_v44 = vadd.f32 %v1610_v43, %v1609_v40  ;;  %v1674_v45 = vpop.f32.mrb[17].mxu1  ;;  %v1612_v46 = vpop.f32.mrb[18].mxu0  ;;  %v401_v40 = vld [vmem:[#allocation2 + $0x70] sm:$0xff] }
 0x152   : > { %1072 = vst [vmem:[#allocation2 + $0x38] sm:$0xff] %v1056_v41  ;;  %v1675_v47 = vadd.f32 %v1674_v45, %v1673_v42  ;;  %v1676_v48 = vpop.f32.mrb[18].mxu1  ;;  %v1613_v49 = vpop.f32.mrb[19].mxu0  ;;  %v402_v45 = vld [vmem:[#allocation2 + $0x78] sm:$0xff] }
 0x153   : > { %v1614_v51 = vadd.f32 %v1613_v49, %v1612_v46  ;;  %v1677_v52 = vpop.f32.mrb[19].mxu1  ;;  %v1085_v49 = vld [vmem:[#allocation2] sm:$0xff] (!%p1482_p10) }
 0x154   : > { %v1019_v53 = vadd.f32 %v1675_v47, %v1611_v44  ;;  %v1678_v54 = vadd.f32 %v1677_v52, %v1676_v48 }
 0x156   : > { %v1057_v56 = vadd.f32 %v1019_v53, %v395_v50  ;;  %v1022_v57 = vadd.f32 %v1678_v54, %v1614_v51  ;;  %v1086_v50 = vld [vmem:[#allocation2 + $0x8] sm:$0xff] (!%p1482_p10)  ;;  %v1087_v51 = vld [vmem:[#allocation2 + $0x10] sm:$0xff] (!%p1482_p10)  ;;  %v1203_v54 = vmul.f32 (!%p1482_p10), %v1085_v49, %v1085_v49 }
 0x157   : > { %v1615_v58 = vpop.f32.mrb[20].mxu0  ;;  %v1525_v52 = vpack.c.bf16 (!%p1482_p10), %v1086_v50, %v1085_v49  ;;  %v1181_v53 = vadd.f32 (!%p1482_p10), %v1086_v50, %v1085_v49 }
 0x158   : > { %1073 = vst [vmem:[#allocation2 + $0x40] sm:$0xff] %v1057_v56  ;;  %v1058_v59 = vadd.f32 %v1022_v57, %v396_v55  ;;  %v1679_v60 = vpop.f32.mrb[20].mxu1  ;;  %v1616_v61 = vpop.f32.mrb[21].mxu0  ;;  %v1204_v55 = vmul.f32 (!%p1482_p10), %v1086_v50, %v1086_v50  ;;  %v1088_v56 = vld [vmem:[#allocation2 + $0x18] sm:$0xff] (!%p1482_p10)  ;;  %v1089_v57 = vld [vmem:[#allocation2 + $0x20] sm:$0xff] (!%p1482_p10) }
 0x159   : > { %v1617_v62 = vadd.f32 %v1616_v61, %v1615_v58  ;;  %v1680_v63 = vpop.f32.mrb[21].mxu1  ;;  %v1618_v0 = vpop.f32.mrb[22].mxu0  ;;  %v1090_v58 = vld [vmem:[#allocation2 + $0x28] sm:$0xff] (!%p1482_p10)  ;;  %1526 = vst [vmem:[%s2119_s2] sm:$0xff] (!%p1482_p10), %v1525_v52  }
 0x15a   : > { %1074 = vst [vmem:[#allocation2 + $0x48] sm:$0xff] %v1058_v59  ;;  %v1681_v1 = vadd.f32 %v1680_v63, %v1679_v60  ;;  %v1682_v2 = vpop.f32.mrb[22].mxu1  ;;  %v1619_v3 = vpop.f32.mrb[23].mxu0  ;;  %v1530_v59 = vpack.c.bf16 (!%p1482_p10), %v1088_v56, %v1087_v51  ;;  %v1205_v60 = vmul.f32 (!%p1482_p10), %v1087_v51, %v1087_v51  ;;  %v1535_v61 = vpack.c.bf16 (!%p1482_p10), %v1090_v58, %v1089_v57 }
 0x15b   : > { %v1620_v5 = vadd.f32 %v1619_v3, %v1618_v0  ;;  %v1683_v6 = vpop.f32.mrb[23].mxu1  ;;  %v1219_v63 = vadd.f32 (!%p1482_p10), %v1204_v55, %v1203_v54  ;;  %v1182_v0 = vadd.f32 (!%p1482_p10), %v1181_v53, %v1087_v51 }
 0x15c   : > { %v1027_v7 = vadd.f32 %v1681_v1, %v1617_v62  ;;  %v1684_v8 = vadd.f32 %v1683_v6, %v1682_v2  ;;  %v1091_v62 = vld [vmem:[#allocation2 + $0x30] sm:$0xff] (!%p1482_p10)  ;;  %v1206_v1 = vmul.f32 (!%p1482_p10), %v1088_v56, %v1088_v56  ;;  %v1092_v2 = vld [vmem:[#allocation2 + $0x38] sm:$0xff] (!%p1482_p10)  ;;  %1562 = vst [vmem:[%s2119_s2 + $0x8] sm:$0xff] (!%p1482_p10), %v1530_v59   ;;  %1563 = vst [vmem:[%s2119_s2 + $0x10] sm:$0xff] (!%p1482_p10), %v1535_v61  }
 0x15e   : > { %v1059_v10 = vadd.f32 %v1027_v7, %v397_v4  ;;  %v1030_v11 = vadd.f32 %v1684_v8, %v1620_v5  ;;  %v1540_v5 = vpack.c.bf16 (!%p1482_p10), %v1092_v2, %v1091_v62  ;;  %v1183_v8 = vadd.f32 (!%p1482_p10), %v1182_v0, %v1088_v56 }
 0x15f   : > { %v1621_v12 = vpop.f32.mrb[24].mxu0  ;;  %v1093_v3 = vld [vmem:[#allocation2 + $0x40] sm:$0xff] (!%p1482_p10) }
 0x160   : > { %1075 = vst [vmem:[#allocation2 + $0x50] sm:$0xff] %v1059_v10  ;;  %v1060_v13 = vadd.f32 %v1030_v11, %v398_v9  ;;  %v1685_v14 = vpop.f32.mrb[24].mxu1  ;;  %v1622_v15 = vpop.f32.mrb[25].mxu0  ;;  %v1220_v9 = vadd.f32 (!%p1482_p10), %v1219_v63, %v1205_v60  ;;  %v1207_v10 = vmul.f32 (!%p1482_p10), %v1089_v57, %v1089_v57  ;;  %1564 = vst [vmem:[%s2119_s2 + $0x18] sm:$0xff] (!%p1482_p10), %v1540_v5  }
 0x161   : > { %v1623_v16 = vadd.f32 %v1622_v15, %v1621_v12  ;;  %v1686_v17 = vpop.f32.mrb[25].mxu1  ;;  %v1624_v18 = vpop.f32.mrb[26].mxu0  ;;  %v1094_v4 = vld [vmem:[#allocation2 + $0x48] sm:$0xff] (!%p1482_p10) }
 0x162   : > { %1076 = vst [vmem:[#allocation2 + $0x58] sm:$0xff] %v1060_v13  ;;  %v1687_v19 = vadd.f32 %v1686_v17, %v1685_v14  ;;  %v1688_v20 = vpop.f32.mrb[26].mxu1  ;;  %v1625_v21 = vpop.f32.mrb[27].mxu0  ;;  %v1545_v6 = vpack.c.bf16 (!%p1482_p10), %v1094_v4, %v1093_v3  ;;  %v1184_v17 = vadd.f32 (!%p1482_p10), %v1183_v8, %v1089_v57 }
 0x163   : > { %v1626_v23 = vadd.f32 %v1625_v21, %v1624_v18  ;;  %v1689_v24 = vpop.f32.mrb[27].mxu1  ;;  %v1208_v18 = vmul.f32 (!%p1482_p10), %v1090_v58, %v1090_v58 }
 0x164   : > { %v1035_v25 = vadd.f32 %v1687_v19, %v1623_v16  ;;  %v1690_v26 = vadd.f32 %v1689_v24, %v1688_v20  ;;  %1565 = vst [vmem:[%s2119_s2 + $0x20] sm:$0xff] (!%p1482_p10), %v1545_v6   ;;  %v1221_v16 = vadd.f32 (!%p1482_p10), %v1220_v9, %v1206_v1  ;;  %v1209_v24 = vmul.f32 (!%p1482_p10), %v1091_v62, %v1091_v62 }
 0x166   : > { %v1061_v28 = vadd.f32 %v1035_v25, %v399_v22  ;;  %v1038_v29 = vadd.f32 %v1690_v26, %v1626_v23  ;;  %v1185_v22 = vadd.f32 (!%p1482_p10), %v1184_v17, %v1090_v58  ;;  %v1222_v23 = vadd.f32 (!%p1482_p10), %v1221_v16, %v1207_v10 }
 0x167   : > { %v1627_v30 = vpop.f32.mrb[28].mxu0  ;;  %v1095_v7 = vld [vmem:[#allocation2 + $0x50] sm:$0xff] (!%p1482_p10) }
 0x168   : > { %1077 = vst [vmem:[#allocation2 + $0x60] sm:$0xff] %v1061_v28  ;;  %v1062_v31 = vadd.f32 %v1038_v29, %v400_v27  ;;  %v1691_v32 = vpop.f32.mrb[28].mxu1  ;;  %v1628_v33 = vpop.f32.mrb[29].mxu0  ;;  %v1223_v25 = vadd.f32 (!%p1482_p10), %v1222_v23, %v1208_v18  ;;  %v1186_v26 = vadd.f32 (!%p1482_p10), %v1185_v22, %v1091_v62  ;;  %v1210_v27 = vmul.f32 (!%p1482_p10), %v1092_v2, %v1092_v2 }
 0x169   : > { %v1629_v34 = vadd.f32 %v1628_v33, %v1627_v30  ;;  %v1692_v35 = vpop.f32.mrb[29].mxu1  ;;  %v1630_v36 = vpop.f32.mrb[30].mxu0  ;;  %v1096_v11 = vld [vmem:[#allocation2 + $0x58] sm:$0xff] (!%p1482_p10)  ;;  %v1211_v30 = vmul.f32 (!%p1482_p10), %v1093_v3, %v1093_v3  ;;  %v1212_v33 = vmul.f32 (!%p1482_p10), %v1094_v4, %v1094_v4 }
 0x16a   : > { %1078 = vst [vmem:[#allocation2 + $0x68] sm:$0xff] %v1062_v31  ;;  %v1693_v37 = vadd.f32 %v1692_v35, %v1691_v32  ;;  %v1694_v38 = vpop.f32.mrb[30].mxu1  ;;  %v1631_v39 = vpop.f32.mrb[31].mxu0  ;;  %v1550_v14 = vpack.c.bf16 (!%p1482_p10), %v1096_v11, %v1095_v7  ;;  %v1187_v28 = vadd.f32 (!%p1482_p10), %v1186_v26, %v1092_v2  ;;  %v1224_v29 = vadd.f32 (!%p1482_p10), %v1223_v25, %v1209_v24 }
 0x16b   : > { %v1632_v41 = vadd.f32 %v1631_v39, %v1630_v36  ;;  %v1695_v42 = vpop.f32.mrb[31].mxu1  ;;  %v1213_v36 = vmul.f32 (!%p1482_p10), %v1095_v7, %v1095_v7  ;;  %v1214_v39 = vmul.f32 (!%p1482_p10), %v1096_v11, %v1096_v11 }
 0x16c   : > { %v1043_v43 = vadd.f32 %v1693_v37, %v1629_v34  ;;  %v1696_v44 = vadd.f32 %v1695_v42, %v1694_v38  ;;  %1084 = sbr.rel (%p1482_p10) target bundleno = 395 (0x18b), region = 59  ;;  %1566 = vst [vmem:[%s2119_s2 + $0x28] sm:$0xff] (!%p1482_p10), %v1550_v14   ;;  %v1225_v31 = vadd.f32 (!%p1482_p10), %v1224_v29, %v1210_v27  ;;  %v1188_v32 = vadd.f32 (!%p1482_p10), %v1187_v28, %v1093_v3 }
 0x16e   : > { %v1063_v46 = vadd.f32 %v1043_v43, %v401_v40  ;;  %v1046_v47 = vadd.f32 %v1696_v44, %v1632_v41  ;;  %v1189_v34 = vadd.f32 (!%p1482_p10), %v1188_v32, %v1094_v4  ;;  %v1226_v35 = vadd.f32 (!%p1482_p10), %v1225_v31, %v1211_v30 }
 0x16f   : > { %v1097_v12 = vld [vmem:[#allocation2 + $0x60] sm:$0xff] (!%p1482_p10) }
 0x170   : > { %1079 = vst [vmem:[#allocation2 + $0x70] sm:$0xff] %v1063_v46  ;;  %v1064_v48 = vadd.f32 %v1046_v47, %v402_v45  ;;  %v1227_v37 = vadd.f32 (!%p1482_p10), %v1226_v35, %v1212_v33  ;;  %v1190_v38 = vadd.f32 (!%p1482_p10), %v1189_v34, %v1095_v7  ;;  %v1215_v42 = vmul.f32 (!%p1482_p10), %v1097_v12, %v1097_v12 }
 0x171   : > { %v1098_v13 = vld [vmem:[#allocation2 + $0x68] sm:$0xff] (!%p1482_p10) }
 0x172   : > { %1080 = vst [vmem:[#allocation2 + $0x78] sm:$0xff] %v1064_v48  ;;  %v1555_v15 = vpack.c.bf16 (!%p1482_p10), %v1098_v13, %v1097_v12  ;;  %v1191_v40 = vadd.f32 (!%p1482_p10), %v1190_v38, %v1096_v11  ;;  %v1228_v41 = vadd.f32 (!%p1482_p10), %v1227_v37, %v1213_v36  ;;  %v1216_v45 = vmul.f32 (!%p1482_p10), %v1098_v13, %v1098_v13 }
 0x174   : > { %1567 = vst [vmem:[%s2119_s2 + $0x30] sm:$0xff] %v1555_v15   ;;  %v1229_v43 = vadd.f32 %v1228_v41, %v1214_v39  ;;  %v1192_v44 = vadd.f32 %v1191_v40, %v1097_v12 }
 0x176   : > { %v1193_v46 = vadd.f32 %v1192_v44, %v1098_v13  ;;  %v1230_v47 = vadd.f32 %v1229_v43, %v1215_v42 }
 0x177   : > { %v1099_v19 = vld [vmem:[#allocation2 + $0x70] sm:$0xff] }
 0x178   : > { %v1217_v48 = vmul.f32 %v1099_v19, %v1099_v19  ;;  %v1231_v49 = vadd.f32 %v1230_v47, %v1216_v45  ;;  %v1194_v50 = vadd.f32 %v1193_v46, %v1099_v19 }
 0x179   : > { %v1100_v20 = vld [vmem:[#allocation2 + $0x78] sm:$0xff] }
 0x17a   : > { %v1560_v21 = vpack.c.bf16 %v1100_v20, %v1099_v19  ;;  %v1218_v51 = vmul.f32 %v1100_v20, %v1100_v20  ;;  %v1195_v52 = vadd.f32 %v1194_v50, %v1100_v20  ;;  %v1232_v53 = vadd.f32 %v1231_v49, %v1217_v48 }
 0x17c   : > { %1568 = vst [vmem:[%s2119_s2 + $0x38] sm:$0xff] %v1560_v21   ;;  %v1196_v54 = vrot.slane %v1195_v52, 4  ;;  %v1233_v55 = vadd.f32 %v1232_v53, %v1218_v51 }
 0x17e   : > { %v1197_v56 = vadd.f32 %v1196_v54, %v1195_v52  ;;  %v1234_v57 = vrot.slane %v1233_v55, 4 }
 0x180   : > { %v1198_v58 = vrot.slane %v1197_v56, 2  ;;  %v1235_v59 = vadd.f32 %v1234_v57, %v1233_v55 }
 0x182   : > { %v1199_v60 = vadd.f32 %v1198_v58, %v1197_v56  ;;  %v1236_v61 = vrot.slane %v1235_v59, 2 }
 0x184   : > { %v1200_v62 = vrot.slane %v1199_v60, 1  ;;  %v1237_v63 = vadd.f32 %v1236_v61, %v1235_v59 }
 0x186   : > { %v1201_v0 = vadd.f32 %v1200_v62, %v1199_v60  ;;  %v1238_v1 = vrot.slane %v1237_v63, 1 }
 0x188   : > { %1202 = vst [vmem:[%s2120_s3] sm:$0x1] %v1201_v0  ;;  %v1239_v2 = vadd.f32 %v1238_v1, %v1237_v63 }
 0x18a   : > { %1240 = vst [vmem:[%s2121_s4] sm:$0x1] %v1239_v2 }
 0x18b PF: > { %s15_s19 = sadd.s32 1, %s1856_s19   ;;  %s2122_s15 = smov %s1844_s16 }
 0x18c   : > { %p12_p11 = scmp.ge.s32.totalorder %s15_s19, 6   ;;  %s2123_s16 = smov %s1919_s23 }
 0x18d   : > { %s2124_s17 = smov %s1852_s18  ;;  %s2125_s18 = smov %s2127_s20 }
 0x18e   :  { %14 = sbr.rel (!%p12_p11) target bundleno = 3 (0x3), region = 122 }

// kernel: _lambda_.12
= control target key start
LH: loop header
LB: loop body
LE: loop exit
PB: predicated region body
PF: predicated region fallthrough
CT: control target
= control target key end

     0   :  { %s148_s0 = inlined_call_operand.vmem [shape: bf16[32,128], index: 0, kind: input, shape index: {}]   ;;  %s149_s1 = inlined_call_operand.vmem [shape: f32[1,128], index: 1, kind: input, shape index: {}]   ;;  %s150_s2 = inlined_call_operand.vmem [shape: f32[1,128], index: 2, kind: input, shape index: {}]   ;;  %s151_s3 = inlined_call_operand.vmem [shape: bf16[32,128], index: 3, kind: output, shape index: {}]  }
   0x1   :  { %v91_v0 = vld [vmem:[%s148_s0] sm:$0xff]   ;;  %v108_v4 = vld [vmem:[%s148_s0 + $0x8] sm:$0xff]  }
   0x2   :  { %v80_v1 = vld [vmem:[%s149_s1] ss:$0 sm:$0xff]  ;;  %v92_v2 = vunpack.c.l.bf16 %v91_v0  ;;  %v93_v3 = vunpack.c.h.bf16 %v91_v0  ;;  %v96_v6 = vunpack.c.l.bf16 %v108_v4  ;;  %v97_v7 = vunpack.c.h.bf16 %v108_v4 }
   0x3   :  { %v81_v5 = vld [vmem:[%s150_s2] ss:$0 sm:$0xff] }
   0x4   :  { %v29_v8 = vmul.f32 %v92_v2, %v80_v1  ;;  %v30_v9 = vmul.f32 %v93_v3, %v80_v1  ;;  %v31_v10 = vmul.f32 %v96_v6, %v80_v1  ;;  %v32_v11 = vmul.f32 %v97_v7, %v80_v1 }
   0x6   :  { %v40_v12 = vadd.f32 %v81_v5, %v29_v8  ;;  %v41_v13 = vadd.f32 %v81_v5, %v30_v9  ;;  %v42_v14 = vadd.f32 %v81_v5, %v31_v10  ;;  %v43_v15 = vadd.f32 %v81_v5, %v32_v11 }
   0x8   :  { %vm44_vm0 = vcmp.ge.f32.partialorder %v40_v12, 0.0  ;;  %vm45_vm1 = vcmp.ge.f32.partialorder %v41_v13, 0.0  ;;  %v48_v16 = vmul.f32 0.2, %v40_v12  ;;  %v49_v17 = vmul.f32 0.2, %v41_v13 }
   0x9   :  { %vm46_vm2 = vcmp.ge.f32.partialorder %v42_v14, 0.0  ;;  %vm47_vm3 = vcmp.ge.f32.partialorder %v43_v15, 0.0  ;;  %v50_v18 = vmul.f32 0.2, %v42_v14  ;;  %v51_v19 = vmul.f32 0.2, %v43_v15 }
   0xa   :  { %v52_v20 = vsel %vm44_vm0, %v40_v12, %v48_v16  ;;  %v53_v21 = vsel %vm45_vm1, %v41_v13, %v49_v17 }
   0xb   :  { %v101_v22 = vpack.c.bf16 %v53_v21, %v52_v20  ;;  %v54_v23 = vsel %vm46_vm2, %v42_v14, %v50_v18  ;;  %v55_v24 = vsel %vm47_vm3, %v43_v15, %v51_v19 }
   0xc   :  { %v106_v25 = vpack.c.bf16 %v55_v24, %v54_v23 }
   0xd   :  { %102 = vst [vmem:[%s151_s3] sm:$0xff] %v101_v22  }
   0xe   :  { %109 = vst [vmem:[%s151_s3 + $0x8] sm:$0xff] %v106_v25  }

// kernel: _lambda_.11
= control target key start
LH: loop header
LB: loop body
LE: loop exit
PB: predicated region body
PF: predicated region fallthrough
CT: control target
= control target key end

     0   :  { %s1248_s15 = smov 0   ;;  %s1250_s16 = smov 0   ;;  %s1371_s0 = inlined_call_operand.vmem [shape: bf16[32,2048], index: 0, kind: input, shape index: {}]   ;;  %s1372_s1 = inlined_call_operand.vmem [shape: bf16[2048,128], index: 1, kind: input, shape index: {}]   ;;  %s1373_s2 = inlined_call_operand.vmem [shape: bf16[32,128], index: 2, kind: output, shape index: {0}]   ;;  %s1374_s3 = inlined_call_operand.vmem [shape: f32[1,1,128], index: 3, kind: output, shape index: {1}]   ;;  %s1375_s4 = inlined_call_operand.vmem [shape: f32[1,1,128], index: 4, kind: output, shape index: {2}]  }
   0x1   :  { %s1252_s17 = smov 0   ;;  %s1254_s18 = smov 0  }
   0x2   :  { %s1256_s19 = smov 0  }
   0x3 LB: > { %s27_s20 = sadd.s32 1, %s1216_s18  ;;  %p50_p1 = scmp.ne.s32.totalorder %s1208_s16, %s1204_s15  ;;  %s1220_s19 = sphi %s1256_s19, %s15_s19   ;;  %s1216_s18 = sphi %s1254_s18, %s1379_s18   ;;  %s1212_s17 = sphi %s1252_s17, %s1378_s17   ;;  %s1208_s16 = sphi %s1250_s16, %s1377_s16   ;;  %s1204_s15 = sphi %s1248_s15, %s1376_s15  }
   0x4   : > { %p28_p0 = scmp.ge.s32.totalorder %s27_s20, 4  ;;  %p51_p2 = scmp.eq.s32.totalorder %s1220_s19, 0 }
   0x5   : > { %s43_s22 = sadd.s32 1, %s1208_s16  ;;  %p965_p5 = scmp.ge.s32.totalorder %s1220_s19, 4 }
   0x6   : > { %s1381_s20 = smov (%p28_p0, %s27_s20), 0  ;;  %p52_p3 = por %p51_p2, %p50_p1 }
   0x7   : > { %s39_s21 = ssub.s32 %s1216_s18, %s1381_s20  ;;  %193 = sbr.rel (%p965_p5) target bundleno = 22 (0x16), region = 20 }
   0x8   : > { %p41_p4 = scmp.eq.s32.totalorder %s39_s21, 0 }
   0xa   : > { %s1283_s23 = scalar_select %p41_p4, %s1208_s16, %s43_s22  }
   0xe   : > { %196 = sbr.rel (!%p52_p3) target bundleno = 22 (0x16), region = 24  ;;  %s198_s24 = sand.u32 (%p52_p3), 1, %s1208_s16  }
   0xf   : > { %s1025_s25 = sshll.u32 (%p52_p3), %s1216_s18, 4  ;;  %s966_s26 = sshll.u32 (%p52_p3), %s198_s24, 6 }
  0x10   : > { %s206_s29 = scalar_lea.vmem (%p52_p3), %s1371_s0, %s1025_s25  ;;  %s200_s30 = scalar_lea.vmem (%p52_p3), [#allocation3], %s966_s26 }
  0x11   : > { %v219_v0 = vld [vmem:[%s206_s29] sm:$0xff] (%p52_p3)  ;;  %v221_v1 = vld [vmem:[%s206_s29 + $0x8] sm:$0xff] (%p52_p3) }
  0x12   : > { %v223_v2 = vld [vmem:[%s206_s29 + $0x40] sm:$0xff] (%p52_p3)  ;;  %220 = vst [vmem:[%s200_s30] sm:$0xff] (%p52_p3), %v219_v0  ;;  %222 = vst [vmem:[%s200_s30 + $0x8] sm:$0xff] (%p52_p3), %v221_v1  ;;  %v225_v3 = vld [vmem:[%s206_s29 + $0x48] sm:$0xff] (%p52_p3) }
  0x13   : > { %224 = vst [vmem:[%s200_s30 + $0x10] sm:$0xff] (%p52_p3), %v223_v2  ;;  %v227_v4 = vld [vmem:[%s206_s29 + $0x80] sm:$0xff] (%p52_p3)  ;;  %v229_v5 = vld [vmem:[%s206_s29 + $0x88] sm:$0xff] (%p52_p3)  ;;  %226 = vst [vmem:[%s200_s30 + $0x18] sm:$0xff] (%p52_p3), %v225_v3 }
  0x14   : > { %228 = vst [vmem:[%s200_s30 + $0x20] sm:$0xff] (%p52_p3), %v227_v4  ;;  %230 = vst [vmem:[%s200_s30 + $0x28] sm:$0xff] (%p52_p3), %v229_v5  ;;  %v231_v6 = vld [vmem:[%s206_s29 + $0xc0] sm:$0xff] (%p52_p3)  ;;  %v233_v7 = vld [vmem:[%s206_s29 + $0xc8] sm:$0xff] (%p52_p3) }
  0x15   : > { %232 = vst [vmem:[%s200_s30 + $0x30] sm:$0xff] %v231_v6  ;;  %234 = vst [vmem:[%s200_s30 + $0x38] sm:$0xff] %v233_v7 }
  0x16 PF: > { %p969_p6 = scmp.ge.s32.totalorder %s1220_s19, 1  ;;  %p239_p7 = scmp.lt.s32.totalorder %s1220_s19, 5 }
  0x18   : > { %p240_p8 = pnand %p969_p6, %p239_p7 }
  0x19   : > { %s246_s5 = sand.u32 (!%p240_p8), 1, %s1204_s15   ;;  %p971_p9 = scmp.ne.s32.totalorder (!%p240_p8), %s1212_s17, 0 }
  0x1a   : > { %243 = sbr.rel (%p240_p8) target bundleno = 333 (0x14d), region = 47  ;;  %s970_s6 = sshll.u32 (!%p240_p8), %s246_s5, 6 }
  0x1b   : > { %s1294_s7 = scalar_lea.vmem (!%p240_p8), [#allocation3], %s970_s6 }
  0x21   : > { %321 = sbr.rel (%p971_p9) target bundleno = 40 (0x28), region = 55  ;;  %v1222_v8 = vmov (!%p971_p9), 0.0  }
  0x22   : > { %322 = vst [vmem:[#allocation2] sm:$0xff] (!%p971_p9), %v1222_v8  ;;  %323 = vst [vmem:[#allocation2 + $0x8] sm:$0xff] (!%p971_p9), %v1222_v8 }
  0x23   : > { %324 = vst [vmem:[#allocation2 + $0x10] sm:$0xff] (!%p971_p9), %v1222_v8  ;;  %325 = vst [vmem:[#allocation2 + $0x18] sm:$0xff] (!%p971_p9), %v1222_v8 }
  0x28 PF: > { %s972_s8 = sshll.u32 %s1212_s17, 9  ;;  %v1172_v9 = vld [vmem:[%s1294_s7 + $0x4] ss:$16 sps:$4 sm:$0xff]   ;;  %v1175_v10 = vld [vmem:[%s1294_s7 + $0xc] ss:$16 sps:$4 sm:$0xff]   ;;  %p1014_p10 = scmp.ne.s32.totalorder %s1212_s17, 3 }
  0x29   : > { %s339_s9 = sshra.s32 %s972_s8, 3  ;;  %671 = vmatprep.mubr.bf16.mxu0 %v1172_v9  ;;  %720 = vmatprep.mubr.bf16.mxu1 %v1175_v10  ;;  %v1170_v41 = vld [vmem:[%s1294_s7] ss:$16 sps:$4 sm:$0xff]   ;;  %v1173_v44 = vld [vmem:[%s1294_s7 + $0x8] ss:$16 sps:$4 sm:$0xff]  }
  0x2a   : > { %s973_s10 = sshll.u32 %s339_s9, 2  ;;  %v1176_v45 = vld [vmem:[%s1294_s7 + $0x24] ss:$16 sps:$4 sm:$0xff]   ;;  %v1178_v46 = vld [vmem:[%s1294_s7 + $0x2c] ss:$16 sps:$4 sm:$0xff]  }
  0x2b   : > { %s1303_s13 = scalar_lea.vmem %s1372_s1, %s973_s10  ;;  %v1180_v47 = vld [vmem:[%s1294_s7 + $0x20] ss:$16 sps:$4 sm:$0xff]   ;;  %v1181_v48 = vld [vmem:[%s1294_s7 + $0x28] ss:$16 sps:$4 sm:$0xff]  }
  0x2c   : > { %v1138_v11 = vld [vmem:[%s1303_s13 + $0x40] sm:$0xff]   ;;  %v1142_v15 = vld [vmem:[%s1303_s13 + $0x48] sm:$0xff]   ;;  %v1146_v19 = vld [vmem:[%s1303_s13 + $0x50] sm:$0xff]  }
  0x2d   : > { %v1139_v12 = vld [vmem:[%s1303_s13 + $0xc0] sm:$0xff]   ;;  %1041 = vmatprep.subr.bf16.mxu0 %v1138_v11  ;;  %v1143_v16 = vld [vmem:[%s1303_s13 + $0xc8] sm:$0xff]   ;;  %v1147_v20 = vld [vmem:[%s1303_s13 + $0xd0] sm:$0xff]  }
  0x2e   : > { %v1140_v13 = vld [vmem:[%s1303_s13] sm:$0xff]   ;;  %1069 = vmatprep.subr.bf16.mxu1 %v1139_v12  ;;  %v1144_v17 = vld [vmem:[%s1303_s13 + $0x8] sm:$0xff]   ;;  %v1148_v21 = vld [vmem:[%s1303_s13 + $0x10] sm:$0xff]  }
  0x2f   : > { %v1141_v14 = vld [vmem:[%s1303_s13 + $0x80] sm:$0xff]   ;;  %1042 = vmatpush3.bf16.msra.mxu0 %v1140_v13  ;;  %v1145_v18 = vld [vmem:[%s1303_s13 + $0x88] sm:$0xff]   ;;  %v1149_v22 = vld [vmem:[%s1303_s13 + $0x90] sm:$0xff]  }
  0x30   : > { %1070 = vmatpush3.bf16.msra.mxu1 %v1141_v14  ;;  %1043 = vmatprep.subr.bf16.mxu0 %v1142_v15  ;;  %v1150_v23 = vld [vmem:[%s1303_s13 + $0x58] sm:$0xff]   ;;  %v1154_v27 = vld [vmem:[%s1303_s13 + $0x60] sm:$0xff]   ;;  %v1158_v31 = vld [vmem:[%s1303_s13 + $0x68] sm:$0xff]  }
  0x31   : > { %1071 = vmatprep.subr.bf16.mxu1 %v1143_v16  ;;  %v1151_v24 = vld [vmem:[%s1303_s13 + $0xd8] sm:$0xff]   ;;  %v1155_v28 = vld [vmem:[%s1303_s13 + $0xe0] sm:$0xff]   ;;  %v1159_v32 = vld [vmem:[%s1303_s13 + $0xe8] sm:$0xff]  }
  0x32   : > { %v1152_v25 = vld [vmem:[%s1303_s13 + $0x18] sm:$0xff]   ;;  %v1156_v29 = vld [vmem:[%s1303_s13 + $0x20] sm:$0xff]   ;;  %v1160_v33 = vld [vmem:[%s1303_s13 + $0x28] sm:$0xff]  }
  0x33   : > { %1044 = vmatpush3.bf16.msra.mxu0 %v1144_v17  ;;  %v1153_v26 = vld [vmem:[%s1303_s13 + $0x98] sm:$0xff]   ;;  %v1157_v30 = vld [vmem:[%s1303_s13 + $0xa0] sm:$0xff]   ;;  %v1161_v34 = vld [vmem:[%s1303_s13 + $0xa8] sm:$0xff]  }
  0x34   : > { %1072 = vmatpush3.bf16.msra.mxu1 %v1145_v18  ;;  %1045 = vmatprep.subr.bf16.mxu0 %v1146_v19  ;;  %v1162_v35 = vld [vmem:[%s1303_s13 + $0x70] sm:$0xff]   ;;  %v1166_v39 = vld [vmem:[%s1303_s13 + $0x78] sm:$0xff]   ;;  %v327_v58 = vld [vmem:[#allocation2] sm:$0xff] }
  0x35   : > { %1073 = vmatprep.subr.bf16.mxu1 %v1147_v20  ;;  %v1163_v36 = vld [vmem:[%s1303_s13 + $0xf0] sm:$0xff]   ;;  %v1167_v40 = vld [vmem:[%s1303_s13 + $0xf8] sm:$0xff]   ;;  %v328_v63 = vld [vmem:[#allocation2 + $0x8] sm:$0xff] }
  0x36   : > { %v1164_v37 = vld [vmem:[%s1303_s13 + $0x30] sm:$0xff]   ;;  %v1168_v42 = vld [vmem:[%s1303_s13 + $0x38] sm:$0xff]  }
  0x37   : > { %1046 = vmatpush3.bf16.msra.mxu0 %v1148_v21  ;;  %v1165_v38 = vld [vmem:[%s1303_s13 + $0xb0] sm:$0xff]   ;;  %v1169_v43 = vld [vmem:[%s1303_s13 + $0xb8] sm:$0xff]  }
  0x38   : > { %1074 = vmatpush3.bf16.msra.mxu1 %v1149_v22  ;;  %1047 = vmatprep.subr.bf16.mxu0 %v1150_v23  ;;  %v329_v12 = vld [vmem:[#allocation2 + $0x10] sm:$0xff]  ;;  %v330_v17 = vld [vmem:[#allocation2 + $0x18] sm:$0xff] }
  0x39   : > { %1075 = vmatprep.subr.bf16.mxu1 %v1151_v24 }
  0x3b   : > { %1048 = vmatpush3.bf16.msra.mxu0 %v1152_v25 }
  0x3c   : > { %1076 = vmatpush3.bf16.msra.mxu1 %v1153_v26  ;;  %1049 = vmatprep.subr.bf16.mxu0 %v1154_v27 }
  0x3d   : > { %1077 = vmatprep.subr.bf16.mxu1 %v1155_v28 }
  0x3f   : > { %1050 = vmatpush3.bf16.msra.mxu0 %v1156_v29 }
  0x40   : > { %1078 = vmatpush3.bf16.msra.mxu1 %v1157_v30  ;;  %1051 = vmatprep.subr.bf16.mxu0 %v1158_v31 }
  0x41   : > { %1079 = vmatprep.subr.bf16.mxu1 %v1159_v32 }
  0x43   : > { %1052 = vmatpush3.bf16.msra.mxu0 %v1160_v33 }
  0x44   : > { %1080 = vmatpush3.bf16.msra.mxu1 %v1161_v34  ;;  %1053 = vmatprep.subr.bf16.mxu0 %v1162_v35 }
  0x45   : > { %1081 = vmatprep.subr.bf16.mxu1 %v1163_v36 }
  0x47   : > { %1054 = vmatpush3.bf16.msra.mxu0 %v1164_v37 }
  0x48   : > { %1082 = vmatpush3.bf16.msra.mxu1 %v1165_v38  ;;  %1055 = vmatprep.subr.bf16.mxu0 %v1166_v39 }
  0x49   : > { %1083 = vmatprep.subr.bf16.mxu1 %v1167_v40 }
  0x4b   : > { %1056 = vmatpush3.bf16.msra.mxu0 %v1168_v42 }
  0x4c   : > { %1084 = vmatpush3.bf16.msra.mxu1 %v1169_v43 }
  0x4e   : > { %672 = vmatmul.mubr.bf16.vlgmr.msra.gmra.mrb[0].mxu0 %v1170_v41 }
  0x4f   : > { %721 = vmatmul.mubr.bf16.vlgmr.msra.gmra.mrb[0].mxu1 %v1173_v44  ;;  %679 = vmatprep.mubr.bf16.mxu0 %v1176_v45 }
  0x50   : > { %728 = vmatprep.mubr.bf16.mxu1 %v1178_v46 }
  0x56   : > { %680 = vmatmul.mubr.bf16.gmra.mrb[4].mxu0 %v1180_v47 }
  0x57   : > { %729 = vmatmul.mubr.bf16.gmra.mrb[4].mxu1 %v1181_v48 }
 0x121   : > { %v1057_v49 = vpop.f32.mrb[0].mxu0 }
 0x122   : > { %v1085_v50 = vpop.f32.mrb[0].mxu1  ;;  %v1058_v51 = vpop.f32.mrb[1].mxu0 }
 0x123   : > { %v1059_v52 = vadd.f32 %v1058_v51, %v1057_v49  ;;  %v1086_v53 = vpop.f32.mrb[1].mxu1  ;;  %v1060_v54 = vpop.f32.mrb[2].mxu0 }
 0x124   : > { %v1087_v55 = vadd.f32 %v1086_v53, %v1085_v50  ;;  %v1088_v56 = vpop.f32.mrb[2].mxu1  ;;  %v1061_v57 = vpop.f32.mrb[3].mxu0 }
 0x125   : > { %v1062_v59 = vadd.f32 %v1061_v57, %v1060_v54  ;;  %v1089_v60 = vpop.f32.mrb[3].mxu1 }
 0x126   : > { %v723_v61 = vadd.f32 %v1087_v55, %v1059_v52  ;;  %v1090_v62 = vadd.f32 %v1089_v60, %v1088_v56 }
 0x128   : > { %v737_v0 = vadd.f32 %v723_v61, %v327_v58  ;;  %v726_v1 = vadd.f32 %v1090_v62, %v1062_v59 }
 0x129   : > { %v1063_v2 = vpop.f32.mrb[4].mxu0 }
 0x12a   : > { %741 = vst [vmem:[#allocation2] sm:$0xff] %v737_v0  ;;  %v738_v3 = vadd.f32 %v726_v1, %v328_v63  ;;  %v1091_v4 = vpop.f32.mrb[4].mxu1  ;;  %v1064_v5 = vpop.f32.mrb[5].mxu0 }
 0x12b   : > { %v1065_v6 = vadd.f32 %v1064_v5, %v1063_v2  ;;  %v1092_v7 = vpop.f32.mrb[5].mxu1  ;;  %v1066_v8 = vpop.f32.mrb[6].mxu0 }
 0x12c   : > { %742 = vst [vmem:[#allocation2 + $0x8] sm:$0xff] %v738_v3  ;;  %v1093_v9 = vadd.f32 %v1092_v7, %v1091_v4  ;;  %v1094_v10 = vpop.f32.mrb[6].mxu1  ;;  %v1067_v11 = vpop.f32.mrb[7].mxu0 }
 0x12d   : > { %v1068_v13 = vadd.f32 %v1067_v11, %v1066_v8  ;;  %v1095_v14 = vpop.f32.mrb[7].mxu1 }
 0x12e   : > { %v731_v15 = vadd.f32 %v1093_v9, %v1065_v6  ;;  %v1096_v16 = vadd.f32 %v1095_v14, %v1094_v10  ;;  %748 = sbr.rel (%p1014_p10) target bundleno = 333 (0x14d), region = 59 }
 0x130   : > { %v739_v18 = vadd.f32 %v731_v15, %v329_v12  ;;  %v734_v19 = vadd.f32 %v1096_v16, %v1068_v13 }
 0x131   : > { %v749_v21 = vld [vmem:[#allocation2] sm:$0xff] (!%p1014_p10) }
 0x132   : > { %743 = vst [vmem:[#allocation2 + $0x10] sm:$0xff] %v739_v18  ;;  %v740_v20 = vadd.f32 %v734_v19, %v330_v17  ;;  %v783_v26 = vmul.f32 (!%p1014_p10), %v749_v21, %v749_v21 }
 0x133   : > { %v750_v22 = vld [vmem:[#allocation2 + $0x8] sm:$0xff] (!%p1014_p10) }
 0x134   : > { %744 = vst [vmem:[#allocation2 + $0x18] sm:$0xff] %v740_v20  ;;  %v1033_v24 = vpack.c.bf16 (!%p1014_p10), %v750_v22, %v749_v21  ;;  %v773_v25 = vadd.f32 (!%p1014_p10), %v750_v22, %v749_v21  ;;  %v784_v27 = vmul.f32 (!%p1014_p10), %v750_v22, %v750_v22 }
 0x136   : > { %1034 = vst [vmem:[%s1373_s2] sm:$0xff] %v1033_v24   ;;  %v787_v31 = vadd.f32 %v784_v27, %v783_v26 }
 0x139   : > { %v751_v23 = vld [vmem:[#allocation2 + $0x10] sm:$0xff] }
 0x13a   : > { %v785_v30 = vmul.f32 %v751_v23, %v751_v23  ;;  %v774_v32 = vadd.f32 %v773_v25, %v751_v23 }
 0x13b   : > { %v752_v28 = vld [vmem:[#allocation2 + $0x18] sm:$0xff] }
 0x13c   : > { %v1038_v29 = vpack.c.bf16 %v752_v28, %v751_v23  ;;  %v786_v33 = vmul.f32 %v752_v28, %v752_v28  ;;  %v775_v34 = vadd.f32 %v774_v32, %v752_v28  ;;  %v788_v35 = vadd.f32 %v787_v31, %v785_v30 }
 0x13e   : > { %1040 = vst [vmem:[%s1373_s2 + $0x8] sm:$0xff] %v1038_v29   ;;  %v776_v36 = vrot.slane %v775_v34, 4  ;;  %v789_v37 = vadd.f32 %v788_v35, %v786_v33 }
 0x140   : > { %v777_v38 = vadd.f32 %v776_v36, %v775_v34  ;;  %v790_v39 = vrot.slane %v789_v37, 4 }
 0x142   : > { %v778_v40 = vrot.slane %v777_v38, 2  ;;  %v791_v41 = vadd.f32 %v790_v39, %v789_v37 }
 0x144   : > { %v779_v42 = vadd.f32 %v778_v40, %v777_v38  ;;  %v792_v43 = vrot.slane %v791_v41, 2 }
 0x146   : > { %v780_v44 = vrot.slane %v779_v42, 1  ;;  %v793_v45 = vadd.f32 %v792_v43, %v791_v41 }
 0x148   : > { %v781_v46 = vadd.f32 %v780_v44, %v779_v42  ;;  %v794_v47 = vrot.slane %v793_v45, 1 }
 0x14a   : > { %782 = vst [vmem:[%s1374_s3] sm:$0x1] %v781_v46  ;;  %v795_v48 = vadd.f32 %v794_v47, %v793_v45 }
 0x14c   : > { %796 = vst [vmem:[%s1375_s4] sm:$0x1] %v795_v48 }
 0x14d PF: > { %s15_s19 = sadd.s32 1, %s1220_s19   ;;  %s1376_s15 = smov %s1208_s16 }
 0x14e   : > { %p12_p11 = scmp.ge.s32.totalorder %s15_s19, 6   ;;  %s1377_s16 = smov %s1283_s23 }
 0x14f   : > { %s1378_s17 = smov %s1216_s18  ;;  %s1379_s18 = smov %s1381_s20 }
 0x150   :  { %14 = sbr.rel (!%p12_p11) target bundleno = 3 (0x3), region = 122 }

// kernel: _lambda_.15
= control target key start
LH: loop header
LB: loop body
LE: loop exit
PB: predicated region body
PF: predicated region fallthrough
CT: control target
= control target key end

     0   :  { %s1013_s12 = smov 0   ;;  %s1015_s13 = smov 0   ;;  %s1129_s0 = inlined_call_operand.vmem [shape: bf16[16,2048], index: 0, kind: input, shape index: {}]   ;;  %s1130_s1 = inlined_call_operand.vmem [shape: bf16[2048,128], index: 1, kind: input, shape index: {}]   ;;  %s1131_s2 = inlined_call_operand.vmem [shape: f32[1,128], index: 2, kind: input, shape index: {}]   ;;  %s1132_s3 = inlined_call_operand.vmem [shape: f32[16,128], index: 3, kind: output, shape index: {}]  }
   0x1   :  { %s1017_s14 = smov 0   ;;  %s1019_s15 = smov 0  }
   0x2   :  { %s1021_s16 = smov 0  }
   0x3 LB: > { %s25_s17 = sadd.s32 1, %s986_s15  ;;  %p48_p1 = scmp.ne.s32.totalorder %s978_s13, %s974_s12  ;;  %s990_s16 = sphi %s1021_s16, %s13_s16   ;;  %s986_s15 = sphi %s1019_s15, %s1136_s15   ;;  %s982_s14 = sphi %s1017_s14, %s1135_s14   ;;  %s978_s13 = sphi %s1015_s13, %s1134_s13   ;;  %s974_s12 = sphi %s1013_s12, %s1133_s12  }
   0x4   : > { %p26_p0 = scmp.ge.s32.totalorder %s25_s17, 4  ;;  %p49_p2 = scmp.eq.s32.totalorder %s990_s16, 0 }
   0x5   : > { %s41_s19 = sadd.s32 1, %s978_s13  ;;  %p777_p5 = scmp.ge.s32.totalorder %s990_s16, 4 }
   0x6   : > { %s1138_s17 = smov (%p26_p0, %s25_s17), 0  ;;  %p50_p3 = por %p49_p2, %p48_p1 }
   0x7   : > { %s37_s18 = ssub.s32 %s986_s15, %s1138_s17  ;;  %167 = sbr.rel (%p777_p5) target bundleno = 21 (0x15), region = 24 }
   0x8   : > { %p39_p4 = scmp.eq.s32.totalorder %s37_s18, 0 }
   0xa   : > { %s1048_s20 = scalar_select %p39_p4, %s978_s13, %s41_s19  }
   0xe   : > { %170 = sbr.rel (!%p50_p3) target bundleno = 21 (0x15), region = 28  ;;  %s172_s21 = sand.u32 (%p50_p3), 1, %s978_s13  }
   0xf   : > { %s828_s22 = sshll.u32 (%p50_p3), %s986_s15, 4  ;;  %s778_s23 = sshll.u32 (%p50_p3), %s172_s21, 5 }
  0x10   : > { %s180_s26 = scalar_lea.vmem (%p50_p3), %s1129_s0, %s828_s22  ;;  %s174_s27 = scalar_lea.vmem (%p50_p3), [#allocation3], %s778_s23 }
  0x11   : > { %v193_v0 = vld [vmem:[%s180_s26] sm:$0xff] (%p50_p3)  ;;  %v195_v1 = vld [vmem:[%s180_s26 + $0x8] sm:$0xff] (%p50_p3) }
  0x12   : > { %v197_v2 = vld [vmem:[%s180_s26 + $0x40] sm:$0xff] (%p50_p3)  ;;  %194 = vst [vmem:[%s174_s27] sm:$0xff] (%p50_p3), %v193_v0  ;;  %196 = vst [vmem:[%s174_s27 + $0x8] sm:$0xff] (%p50_p3), %v195_v1  ;;  %v199_v3 = vld [vmem:[%s180_s26 + $0x48] sm:$0xff] (%p50_p3) }
  0x13   : > { %198 = vst [vmem:[%s174_s27 + $0x10] sm:$0xff] (%p50_p3), %v197_v2  ;;  %200 = vst [vmem:[%s174_s27 + $0x18] sm:$0xff] (%p50_p3), %v199_v3 }
  0x15 PF: > { %p781_p6 = scmp.ge.s32.totalorder %s990_s16, 1  ;;  %p205_p7 = scmp.lt.s32.totalorder %s990_s16, 5 }
  0x17   : > { %p206_p8 = pnand %p781_p6, %p205_p7 }
  0x18   : > { %s212_s28 = sand.u32 (!%p206_p8), 1, %s974_s12   ;;  %p783_p9 = scmp.ne.s32.totalorder (!%p206_p8), %s982_s14, 0 }
  0x19   : > { %209 = sbr.rel (%p206_p8) target bundleno = 310 (0x136), region = 51  ;;  %s782_s29 = sshll.u32 (!%p206_p8), %s212_s28, 5 }
  0x1a   : > { %s1059_s30 = scalar_lea.vmem (!%p206_p8), [#allocation3], %s782_s29 }
  0x20   : > { %267 = sbr.rel (%p783_p9) target bundleno = 39 (0x27), region = 59  ;;  %v992_v4 = vmov (!%p783_p9), 0.0  }
  0x21   : > { %268 = vst [vmem:[#allocation2] sm:$0xff] (!%p783_p9), %v992_v4  ;;  %269 = vst [vmem:[#allocation2 + $0x8] sm:$0xff] (!%p783_p9), %v992_v4 }
  0x27 PF: > { %s784_s4 = sshll.u32 %s982_s14, 9  ;;  %v948_v5 = vld [vmem:[%s1059_s30 + $0x4] ss:$16 sps:$4 sm:$0xff]   ;;  %v951_v6 = vld [vmem:[%s1059_s30 + $0xc] ss:$16 sps:$4 sm:$0xff]   ;;  %p822_p10 = scmp.ne.s32.totalorder %s982_s14, 3 }
  0x28   : > { %s277_s5 = sshra.s32 %s784_s4, 3  ;;  %589 = vmatprep.mubr.bf16.mxu0 %v948_v5  ;;  %630 = vmatprep.mubr.bf16.mxu1 %v951_v6  ;;  %v946_v37 = vld [vmem:[%s1059_s30] ss:$16 sps:$4 sm:$0xff]   ;;  %v949_v40 = vld [vmem:[%s1059_s30 + $0x8] ss:$16 sps:$4 sm:$0xff]  }
  0x29   : > { %s785_s6 = sshll.u32 %s277_s5, 2  ;;  %v271_v50 = vld [vmem:[#allocation2] sm:$0xff]  ;;  %v272_v55 = vld [vmem:[#allocation2 + $0x8] sm:$0xff] }
  0x2a   : > { %s1068_s9 = scalar_lea.vmem %s1130_s1, %s785_s6  ;;  %v823_v60 = vld [vmem:[%s1131_s2] ss:$0 sm:$0xff] (!%p822_p10) }
  0x2b   : > { %v914_v7 = vld [vmem:[%s1068_s9 + $0x40] sm:$0xff]   ;;  %v918_v11 = vld [vmem:[%s1068_s9 + $0x48] sm:$0xff]   ;;  %v922_v15 = vld [vmem:[%s1068_s9 + $0x50] sm:$0xff]  }
  0x2c   : > { %v915_v8 = vld [vmem:[%s1068_s9 + $0xc0] sm:$0xff]   ;;  %829 = vmatprep.subr.bf16.mxu0 %v914_v7  ;;  %v919_v12 = vld [vmem:[%s1068_s9 + $0xc8] sm:$0xff]   ;;  %v923_v16 = vld [vmem:[%s1068_s9 + $0xd0] sm:$0xff]  }
  0x2d   : > { %v916_v9 = vld [vmem:[%s1068_s9] sm:$0xff]   ;;  %851 = vmatprep.subr.bf16.mxu1 %v915_v8  ;;  %v920_v13 = vld [vmem:[%s1068_s9 + $0x8] sm:$0xff]   ;;  %v924_v17 = vld [vmem:[%s1068_s9 + $0x10] sm:$0xff]  }
  0x2e   : > { %v917_v10 = vld [vmem:[%s1068_s9 + $0x80] sm:$0xff]   ;;  %830 = vmatpush3.bf16.msra.mxu0 %v916_v9  ;;  %v921_v14 = vld [vmem:[%s1068_s9 + $0x88] sm:$0xff]   ;;  %v925_v18 = vld [vmem:[%s1068_s9 + $0x90] sm:$0xff]  }
  0x2f   : > { %852 = vmatpush3.bf16.msra.mxu1 %v917_v10  ;;  %831 = vmatprep.subr.bf16.mxu0 %v918_v11  ;;  %v926_v19 = vld [vmem:[%s1068_s9 + $0x58] sm:$0xff]   ;;  %v930_v23 = vld [vmem:[%s1068_s9 + $0x60] sm:$0xff]   ;;  %v934_v27 = vld [vmem:[%s1068_s9 + $0x68] sm:$0xff]  }
  0x30   : > { %853 = vmatprep.subr.bf16.mxu1 %v919_v12  ;;  %v927_v20 = vld [vmem:[%s1068_s9 + $0xd8] sm:$0xff]   ;;  %v931_v24 = vld [vmem:[%s1068_s9 + $0xe0] sm:$0xff]   ;;  %v935_v28 = vld [vmem:[%s1068_s9 + $0xe8] sm:$0xff]  }
  0x31   : > { %v928_v21 = vld [vmem:[%s1068_s9 + $0x18] sm:$0xff]   ;;  %v932_v25 = vld [vmem:[%s1068_s9 + $0x20] sm:$0xff]   ;;  %v936_v29 = vld [vmem:[%s1068_s9 + $0x28] sm:$0xff]  }
  0x32   : > { %832 = vmatpush3.bf16.msra.mxu0 %v920_v13  ;;  %v929_v22 = vld [vmem:[%s1068_s9 + $0x98] sm:$0xff]   ;;  %v933_v26 = vld [vmem:[%s1068_s9 + $0xa0] sm:$0xff]   ;;  %v937_v30 = vld [vmem:[%s1068_s9 + $0xa8] sm:$0xff]  }
  0x33   : > { %854 = vmatpush3.bf16.msra.mxu1 %v921_v14  ;;  %833 = vmatprep.subr.bf16.mxu0 %v922_v15  ;;  %v938_v31 = vld [vmem:[%s1068_s9 + $0x70] sm:$0xff]   ;;  %v942_v35 = vld [vmem:[%s1068_s9 + $0x78] sm:$0xff]  }
  0x34   : > { %855 = vmatprep.subr.bf16.mxu1 %v923_v16  ;;  %v939_v32 = vld [vmem:[%s1068_s9 + $0xf0] sm:$0xff]   ;;  %v943_v36 = vld [vmem:[%s1068_s9 + $0xf8] sm:$0xff]  }
  0x35   : > { %v940_v33 = vld [vmem:[%s1068_s9 + $0x30] sm:$0xff]   ;;  %v944_v38 = vld [vmem:[%s1068_s9 + $0x38] sm:$0xff]  }
  0x36   : > { %834 = vmatpush3.bf16.msra.mxu0 %v924_v17  ;;  %v941_v34 = vld [vmem:[%s1068_s9 + $0xb0] sm:$0xff]   ;;  %v945_v39 = vld [vmem:[%s1068_s9 + $0xb8] sm:$0xff]  }
  0x37   : > { %856 = vmatpush3.bf16.msra.mxu1 %v925_v18  ;;  %835 = vmatprep.subr.bf16.mxu0 %v926_v19 }
  0x38   : > { %857 = vmatprep.subr.bf16.mxu1 %v927_v20 }
  0x3a   : > { %836 = vmatpush3.bf16.msra.mxu0 %v928_v21 }
  0x3b   : > { %858 = vmatpush3.bf16.msra.mxu1 %v929_v22  ;;  %837 = vmatprep.subr.bf16.mxu0 %v930_v23 }
  0x3c   : > { %859 = vmatprep.subr.bf16.mxu1 %v931_v24 }
  0x3e   : > { %838 = vmatpush3.bf16.msra.mxu0 %v932_v25 }
  0x3f   : > { %860 = vmatpush3.bf16.msra.mxu1 %v933_v26  ;;  %839 = vmatprep.subr.bf16.mxu0 %v934_v27 }
  0x40   : > { %861 = vmatprep.subr.bf16.mxu1 %v935_v28 }
  0x42   : > { %840 = vmatpush3.bf16.msra.mxu0 %v936_v29 }
  0x43   : > { %862 = vmatpush3.bf16.msra.mxu1 %v937_v30  ;;  %841 = vmatprep.subr.bf16.mxu0 %v938_v31 }
  0x44   : > { %863 = vmatprep.subr.bf16.mxu1 %v939_v32 }
  0x46   : > { %842 = vmatpush3.bf16.msra.mxu0 %v940_v33 }
  0x47   : > { %864 = vmatpush3.bf16.msra.mxu1 %v941_v34  ;;  %843 = vmatprep.subr.bf16.mxu0 %v942_v35 }
  0x48   : > { %865 = vmatprep.subr.bf16.mxu1 %v943_v36 }
  0x4a   : > { %844 = vmatpush3.bf16.msra.mxu0 %v944_v38 }
  0x4b   : > { %866 = vmatpush3.bf16.msra.mxu1 %v945_v39 }
  0x4d   : > { %590 = vmatmul.mubr.bf16.vlgmr.msra.gmra.mrb[0].mxu0 %v946_v37 }
  0x4e   : > { %631 = vmatmul.mubr.bf16.vlgmr.msra.gmra.mrb[0].mxu1 %v949_v40 }
 0x120   : > { %v845_v41 = vpop.f32.mrb[0].mxu0 }
 0x121   : > { %v867_v42 = vpop.f32.mrb[0].mxu1  ;;  %v846_v43 = vpop.f32.mrb[1].mxu0 }
 0x122   : > { %v847_v44 = vadd.f32 %v846_v43, %v845_v41  ;;  %v868_v45 = vpop.f32.mrb[1].mxu1  ;;  %v848_v46 = vpop.f32.mrb[2].mxu0 }
 0x123   : > { %v869_v47 = vadd.f32 %v868_v45, %v867_v42  ;;  %v870_v48 = vpop.f32.mrb[2].mxu1  ;;  %v849_v49 = vpop.f32.mrb[3].mxu0 }
 0x124   : > { %v850_v51 = vadd.f32 %v849_v49, %v848_v46  ;;  %v871_v52 = vpop.f32.mrb[3].mxu1 }
 0x125   : > { %v633_v53 = vadd.f32 %v869_v47, %v847_v44  ;;  %v872_v54 = vadd.f32 %v871_v52, %v870_v48  ;;  %646 = sbr.rel (%p822_p10) target bundleno = 310 (0x136), region = 63 }
 0x127   : > { %v639_v56 = vadd.f32 %v633_v53, %v271_v50  ;;  %v636_v57 = vadd.f32 %v872_v54, %v850_v51 }
 0x129   : > { %641 = vst [vmem:[#allocation2] sm:$0xff] %v639_v56  ;;  %v640_v58 = vadd.f32 %v636_v57, %v272_v55 }
 0x12b   : > { %642 = vst [vmem:[#allocation2 + $0x8] sm:$0xff] %v640_v58 }
 0x130   : > { %v647_v59 = vld [vmem:[#allocation2] sm:$0xff] }
 0x131   : > { %v656_v62 = vadd.f32 %v823_v60, %v647_v59 }
 0x132   : > { %v648_v61 = vld [vmem:[#allocation2 + $0x8] sm:$0xff] }
 0x133   : > { %v657_v63 = vadd.f32 %v823_v60, %v648_v61  ;;  %658 = vst [vmem:[%s1132_s3] sm:$0xff] %v656_v62 }
 0x135   : > { %659 = vst [vmem:[%s1132_s3 + $0x8] sm:$0xff] %v657_v63 }
 0x136 PF: > { %s13_s16 = sadd.s32 1, %s990_s16   ;;  %s1133_s12 = smov %s978_s13 }
 0x137   : > { %p10_p11 = scmp.ge.s32.totalorder %s13_s16, 6   ;;  %s1134_s13 = smov %s1048_s20 }
 0x138   : > { %s1135_s14 = smov %s986_s15  ;;  %s1136_s15 = smov %s1138_s17 }
 0x139   :  { %12 = sbr.rel (!%p10_p11) target bundleno = 3 (0x3), region = 105 }

</bundles_post_ra>
